<compile_context>
chip_gen: v6e
topology: v6e:2x2x1
jax: 0.10.0
libtpu: 0.0.40
codegen_flags: <defaults>
</compile_context>

<pallas_src>
import numpy as np
import jax
import jax.numpy as jnp
from jax.experimental import pallas as pl
from jax.experimental.pallas import tpu as pltpu

NEG_SLOPE = 0.2                        # nn.LeakyReLU(0.2), act_fn='lrelu'
VMEM_LIMIT_BYTES = 48 * 1024 * 1024    # explicit budget: fits v5e/v6e (128 MiB) and v7x (64 MiB) VMEM


def _lrelu(x):
    return jnp.where(x >= 0, x, NEG_SLOPE * x)


def _compiler_params(grid_rank):
    return pltpu.CompilerParams(
        dimension_semantics=("parallel",) * grid_rank,
        vmem_limit_bytes=VMEM_LIMIT_BYTES)


# --------------------------------------------------------------------------------------
# In-kernel helpers (operate on values already loaded into vregs/VMEM)
# --------------------------------------------------------------------------------------
def _pad_hw_1(a):
    """Zero-pad a (H, W, C) array by 1 pixel on H and W, built in VMEM (no HBM copy)."""
    H, W, C = a.shape
    zrow = jnp.zeros((1, W, C), a.dtype)
    a = jnp.concatenate([zrow, a, zrow], axis=0)
    zcol = jnp.zeros((H + 2, 1, C), a.dtype)
    return jnp.concatenate([zcol, a, zcol], axis=1)


def _im2col_3x3(a):
    """(H, W, C) -> (H*W, 9*C) patches, ordered (ky, kx, c) to match a
    (3, 3, C, Cout) weight reshaped to (9*C, Cout)."""
    H, W, C = a.shape
    ap = _pad_hw_1(a)
    cols = [ap[ky:ky + H, kx:kx + W, :] for ky in range(3) for kx in range(3)]
    return jnp.concatenate(cols, axis=-1).reshape(H * W, 9 * C)


def _avgpool2(a):
    """2x2 average pooling of (H, W, C) via VPU adds (no dense pooling matmul)."""
    H, W, C = a.shape
    ar = a.reshape(H // 2, 2, W, C)
    rows = ar[:, 0] + ar[:, 1]                     # (H/2, W, C)
    rc = rows.reshape(H // 2, W // 2, 2, C)
    return (rc[:, :, 0] + rc[:, :, 1]) * 0.25      # (H/2, W/2, C)


def _conv3x3(a, w2d_ref, b_ref, mm_dtype):
    """3x3 conv (stride 1, pad 1) as ONE im2col matmul. Returns (H*W, Cout) in f32."""
    patches = _im2col_3x3(a).astype(mm_dtype)
    out = jnp.dot(patches, w2d_ref[...].astype(mm_dtype),
                  preferred_element_type=jnp.float32)
    return out + b_ref[...].astype(jnp.float32)


# --------------------------------------------------------------------------------------
# Stem conv kernel: Conv2d(3, C0, 3x3, pad=1), gridded over N
# --------------------------------------------------------------------------------------
def _make_stem_kernel(mm_dtype):
    def kernel(x_ref, w_ref, b_ref, o_ref):
        x = x_ref[0].astype(jnp.float32)                       # (H, W, Cin)
        H, W, _ = x.shape
        Cout = w_ref.shape[-1]
        out = _conv3x3(x, w_ref, b_ref, mm_dtype)              # (H*W, Cout)
        o_ref[0] = out.reshape(H, W, Cout).astype(o_ref.dtype)
    return kernel


def stem_conv_pallas(x, w, b, mm_dtype):
    N, H, W, Cin = x.shape
    Cout = w.shape[-1]
    w2d = w.reshape(9 * Cin, Cout)
    return pl.pallas_call(
        _make_stem_kernel(mm_dtype),
        out_shape=jax.ShapeDtypeStruct((N, H, W, Cout), x.dtype),
        grid=(N,),
        in_specs=[
            pl.BlockSpec((1, H, W, Cin), lambda n: (n, 0, 0, 0)),
            pl.BlockSpec(w2d.shape, lambda n: (0, 0)),
            pl.BlockSpec(b.shape, lambda n: (0, 0)),
        ],
        out_specs=pl.BlockSpec((1, H, W, Cout), lambda n: (n, 0, 0, 0)),
        compiler_params=_compiler_params(1),
    )(x, w2d, b)


# --------------------------------------------------------------------------------------
# Fused pre-activation ResBlock kernel:
#   [optional AvgPool2d(2)] + 1x1 shortcut + conv1(act(x)) + conv2(act(h)) + residual
#   [+ optional global mean(lrelu(out)) for the last block, feeding the head]
# --------------------------------------------------------------------------------------
def _make_resblock_kernel(has_shortcut, pool_in, pool_out, mm_dtype):
    def kernel(*refs):
        if has_shortcut:
            x_ref, w1_ref, b1_ref, w2_ref, b2_ref, ws_ref, o_ref = refs
        else:
            x_ref, w1_ref, b1_ref, w2_ref, b2_ref, o_ref = refs

        x = x_ref[0].astype(jnp.float32)                       # (H, W, Cin)
        if pool_in:
            x = _avgpool2(x)                                   # stage-entry AvgPool2d(2)
        Ho, Wo, Cin = x.shape
        Cout = w1_ref.shape[-1]

        # shortcut sees the (pooled) raw x, NOT the activated x (pre-activation block)
        if has_shortcut:
            sc = jnp.dot(x.reshape(Ho * Wo, Cin).astype(mm_dtype),
                         ws_ref[...].astype(mm_dtype),
                         preferred_element_type=jnp.float32)
        else:
            sc = x.reshape(Ho * Wo, Cout)                      # identity (Cin == Cout)

        h = _conv3x3(_lrelu(x), w1_ref, b1_ref, mm_dtype)      # conv1(act(x))
        h = h.reshape(Ho, Wo, Cout)
        out = _conv3x3(_lrelu(h), w2_ref, b2_ref, mm_dtype)    # conv2(act(h))
        out = out + sc                                         # (Ho*Wo, Cout)

        if pool_out:
            # last block: fuse the head's GlobalAveragePooling(act(out))
            pooled = jnp.mean(_lrelu(out), axis=0, keepdims=True)   # (1, Cout)
            o_ref[0] = pooled.astype(o_ref.dtype)
        else:
            o_ref[0] = out.reshape(Ho, Wo, Cout).astype(o_ref.dtype)
    return kernel


def _resblock_vmem_estimate_bytes(H, W, Cin, Cout, pool_in):
    Ho, Wo = (H // 2, W // 2) if pool_in else (H, W)
    elems = (H * W * Cin                           # input block
             + Ho * Wo * (9 * Cin + 9 * Cout)      # im2col patches
             + Ho * Wo * Cout * 3                  # h, shortcut, out
             + 9 * Cin * Cout + 9 * Cout * Cout + Cin * Cout)
    return 4 * elems * 2                           # f32, x2 headroom for double-buffering


def resblock_pallas(x, blk, *, pool_in, pool_out, mm_dtype):
    N, H, W, Cin = x.shape
    w1, b1, w2, b2, ws = blk['w1'], blk['b1'], blk['w2'], blk['b2'], blk['short_w']
    Cout = w1.shape[-1]
    Ho, Wo = (H // 2, W // 2) if pool_in else (H, W)

    # TODO(synk): add halo-aware H-row tiling for large spatial sizes instead of per-image blocks.
    assert _resblock_vmem_estimate_bytes(H, W, Cin, Cout, pool_in) < VMEM_LIMIT_BYTES, (
        "per-image block exceeds the VMEM budget; needs H-row tiling")

    w1_2d = w1.reshape(9 * Cin, Cout)
    w2_2d = w2.reshape(9 * Cout, Cout)
    args = [x, w1_2d, b1, w2_2d, b2]
    in_specs = [
        pl.BlockSpec((1, H, W, Cin), lambda n: (n, 0, 0, 0)),
        pl.BlockSpec(w1_2d.shape, lambda n: (0, 0)),
        pl.BlockSpec(b1.shape, lambda n: (0, 0)),
        pl.BlockSpec(w2_2d.shape, lambda n: (0, 0)),
        pl.BlockSpec(b2.shape, lambda n: (0, 0)),
    ]
    has_shortcut = ws is not None
    if has_shortcut:
        ws_2d = ws.reshape(Cin, Cout)
        args.append(ws_2d)
        in_specs.append(pl.BlockSpec(ws_2d.shape, lambda n: (0, 0)))

    if pool_out:
        out_shape = jax.ShapeDtypeStruct((N, 1, Cout), x.dtype)
        out_spec = pl.BlockSpec((1, 1, Cout), lambda n: (n, 0, 0))
    else:
        out_shape = jax.ShapeDtypeStruct((N, Ho, Wo, Cout), x.dtype)
        out_spec = pl.BlockSpec((1, Ho, Wo, Cout), lambda n: (n, 0, 0, 0))

    return pl.pallas_call(
        _make_resblock_kernel(has_shortcut, pool_in, pool_out, mm_dtype),
        out_shape=out_shape,
        grid=(N,),
        in_specs=in_specs,
        out_specs=out_spec,
        compiler_params=_compiler_params(1),
    )(*args)


# --------------------------------------------------------------------------------------
# Head MLP kernel: batched (N, C) @ (C, 2048) -> LeakyReLU -> @ (2048, 1) -> /tau
# (the lrelu + global average pool was fused into the last ResBlock kernel)
# --------------------------------------------------------------------------------------
def _make_head_kernel(N, C, tau, mm_dtype):
    inv_tau = 1.0 / float(tau)

    def kernel(p_ref, w1_ref, b1_ref, w2_ref, b2_ref, o_ref):
        p = p_ref[...].astype(jnp.float32).reshape(N, C)
        h = jnp.dot(p.astype(mm_dtype), w1_ref[...].astype(mm_dtype),
                    preferred_element_type=jnp.float32) + b1_ref[...]
        h = _lrelu(h)
        f = jnp.dot(h.astype(mm_dtype), w2_ref[...].astype(mm_dtype),
                    preferred_element_type=jnp.float32) + b2_ref[...]
        o_ref[...] = (f * inv_tau).astype(o_ref.dtype)
    return kernel


def head_mlp_pallas(pooled, w1, b1, w2, b2, tau, mm_dtype):
    N, _, C = pooled.shape
    vmem = pl.BlockSpec(memory_space=pltpu.MemorySpace.VMEM)
    return pl.pallas_call(
        _make_head_kernel(N, C, tau, mm_dtype),
        out_shape=jax.ShapeDtypeStruct((N, 1), pooled.dtype),
        in_specs=[vmem] * 5,
        out_specs=vmem,
        compiler_params=pltpu.CompilerParams(vmem_limit_bytes=VMEM_LIMIT_BYTES),
    )(pooled, w1, b1, w2, b2)


# --------------------------------------------------------------------------------------
# Parameter init (matches PyTorch __init__: kaiming_normal fan_in/'linear' for convs with
# zero bias; normal(0, 0.01) for Linear weights with zero bias; 1x1 shortcut has no bias)
# --------------------------------------------------------------------------------------
def init_params(key, layers):
    keys = jax.random.split(key, 64)
    ki = iter(range(64))

    def conv_w(k, kh, kw, cin, cout):
        std = 1.0 / np.sqrt(cin * kh * kw)        # kaiming fan_in, gain('linear') = 1
        return std * jax.random.normal(k, (kh, kw, cin, cout), jnp.float32)

    c0 = layers[0][0]
    params = {
        'stem_w': conv_w(keys[next(ki)], 3, 3, 3, c0),
        'stem_b': jnp.zeros((1, c0), jnp.float32),
    }
    blocks = []
    in_c = c0
    for (out_c, nb) in layers:
        for _ in range(nb):
            blk = {
                'w1': conv_w(keys[next(ki)], 3, 3, in_c, out_c),
                'b1': jnp.zeros((1, out_c), jnp.float32),
                'w2': conv_w(keys[next(ki)], 3, 3, out_c, out_c),
                'b2': jnp.zeros((1, out_c), jnp.float32),
                'short_w': (conv_w(keys[next(ki)], 1, 1, in_c, out_c)
                            if in_c != out_c else None),
            }
            blocks.append(blk)
            in_c = out_c
    params['blocks'] = blocks
    params['head_w1'] = 0.01 * jax.random.normal(keys[next(ki)], (in_c, 2048), jnp.float32)
    params['head_b1'] = jnp.zeros((1, 2048), jnp.float32)
    params['head_w2'] = 0.01 * jax.random.normal(keys[next(ki)], (2048, 1), jnp.float32)
    params['head_b2'] = jnp.zeros((1, 1), jnp.float32)
    return params


# --------------------------------------------------------------------------------------
# Forward pass (Pallas) and pure-JAX reference for validation
# --------------------------------------------------------------------------------------
def resnet_forward(x_nchw, params, layers, tau=1e-5, mm_dtype=jnp.bfloat16):
    x = jnp.transpose(x_nchw, (0, 2, 3, 1)).astype(jnp.float32)   # NCHW -> NHWC
    x = stem_conv_pallas(x, params['stem_w'], params['stem_b'], mm_dtype)
    blocks = params['blocks']
    assert len(blocks) >= 1, "config must contain at least one ResBlock"
    bi = 0
    for i, (out_c, nb) in enumerate(layers):
        for j in range(nb):
            x = resblock_pallas(
                x, blocks[bi],
                pool_in=(i > 0 and j == 0),               # stage-entry AvgPool2d(2)
                pool_out=(bi == len(blocks) - 1),         # fuse global lrelu+mean pool
                mm_dtype=mm_dtype)
            bi += 1
    # x is now the pooled features (N, 1, C_last)
    return head_mlp_pallas(x, params['head_w1'], params['head_b1'],
                           params['head_w2'], params['head_b2'], tau, mm_dtype)


def resnet_reference(x_nchw, params, layers, tau=1e-5):
    x = jnp.transpose(x_nchw, (0, 2, 3, 1)).astype(jnp.float32)

    def conv(xx, w, b, pad):
        y = jax.lax.conv_general_dilated(
            xx, w, window_strides=(1, 1), padding=[(pad, pad), (pad, pad)],
            dimension_numbers=('NHWC', 'HWIO', 'NHWC'))
        return y + b.reshape(1, 1, 1, -1)

    x = conv(x, params['stem_w'], params['stem_b'], 1)
    bi = 0
    for i, (out_c, nb) in enumerate(layers):
        if i > 0:
            N, H, W, C = x.shape
            x = x.reshape(N, H // 2, 2, W // 2, 2, C).mean(axis=(2, 4))
        for _ in range(nb):
            blk = params['blocks'][bi]; bi += 1
            sc = x if blk['short_w'] is None else conv(
                x, blk['short_w'], jnp.zeros((1,), jnp.float32), 0)
            h = conv(_lrelu(x), blk['w1'], blk['b1'], 1)
            x = conv(_lrelu(h), blk['w2'], blk['b2'], 1) + sc
    p = _lrelu(x).mean(axis=(1, 2))
    h = _lrelu(p @ params['head_w1'] + params['head_b1'])
    f = h @ params['head_w2'] + params['head_b2']
    return f / tau


if __name__ == "__main__":
    layers = [(8, 1), (16, 1)]        # small config: ResNet(layers=[(8,1),(16,1)])
    tau = 1e-5
    x = jax.random.normal(jax.random.PRNGKey(0), (2, 3, 16, 16), jnp.float32)  # NCHW
    params = init_params(jax.random.PRNGKey(1), layers)

    ref = resnet_reference(x, params, layers, tau)

    # Exact-math check (f32 matmul operands)
    out_f32 = jax.block_until_ready(
        resnet_forward(x, params, layers, tau, mm_dtype=jnp.float32))
    assert out_f32.shape == (2, 1), out_f32.shape
    err_f32 = float(jnp.max(jnp.abs(out_f32 - ref)) / (jnp.max(jnp.abs(ref)) + 1e-6))
    assert err_f32 < 1e-3, f"f32 mismatch vs reference: rel err {err_f32}"

    # Performance path (bf16 matmul operands, f32 accumulation) — looser tolerance
    out_bf16 = jax.block_until_ready(
        resnet_forward(x, params, layers, tau, mm_dtype=jnp.bfloat16))
    err_bf16 = float(jnp.max(jnp.abs(out_bf16 - ref)) / (jnp.max(jnp.abs(ref)) + 1e-6))
    assert err_bf16 < 5e-2, f"bf16 mismatch vs reference: rel err {err_bf16}"

    print("KERNEL_OK")
</pallas_src>

<mosaic_0001>
module attributes {stable_mosaic.version = 11 : i64} {
  func.func @kernel(%arg0: i32, %arg1: memref<1x16x16x3xf32, #tpu.memory_space<vmem>>, %arg2: memref<27x8xf32, #tpu.memory_space<vmem>>, %arg3: memref<1x8xf32, #tpu.memory_space<vmem>>, %arg4: memref<1x16x16x8xf32, #tpu.memory_space<vmem>>) attributes {dimension_semantics = [#tpu.dimension_semantics<parallel>], iteration_bounds = array<i64: 2>, scalar_prefetch = 0 : i64, scratch_operands = 0 : i64, tpu.core_type = #tpu.core_type<tc>, window_params = [{transform_indices = @transform_0, window_bounds = array<i64: 1, 16, 16, 3>}, {pipeline_mode = #tpu.pipeline_mode<synchronous>, transform_indices = @transform_1, window_bounds = array<i64: 27, 8>}, {pipeline_mode = #tpu.pipeline_mode<synchronous>, transform_indices = @transform_2, window_bounds = array<i64: 1, 8>}, {transform_indices = @transform_3, window_bounds = array<i64: 1, 16, 16, 8>}]} {
    %c0 = arith.constant 0 : index
    %c0_0 = arith.constant 0 : index
    %c0_1 = arith.constant 0 : index
    %c0_2 = arith.constant 0 : index
    %0 = vector.load %arg1[%c0, %c0_0, %c0_1, %c0_2] : memref<1x16x16x3xf32, #tpu.memory_space<vmem>>, vector<1x16x16x3xf32>
    %1 = vector.shape_cast %0 : vector<1x16x16x3xf32> to vector<16x16x3xf32>
    %cst = arith.constant 0.000000e+00 : f32
    %2 = vector.broadcast %cst : f32 to vector<1x16x3xf32>
    %3 = tpu.concatenate %2, %1, %2 in 0 : vector<1x16x3xf32>, vector<16x16x3xf32>, vector<1x16x3xf32> -> vector<18x16x3xf32>
    %cst_3 = arith.constant 0.000000e+00 : f32
    %4 = vector.broadcast %cst_3 : f32 to vector<18x1x3xf32>
    %5 = tpu.concatenate %4, %3, %4 in 1 : vector<18x1x3xf32>, vector<18x16x3xf32>, vector<18x1x3xf32> -> vector<18x18x3xf32>
    %6 = vector.extract_strided_slice %5 {offsets = [0, 0, 0], sizes = [16, 16, 3], strides = [1, 1, 1]} : vector<18x18x3xf32> to vector<16x16x3xf32>
    %7 = vector.extract_strided_slice %5 {offsets = [0, 1, 0], sizes = [16, 16, 3], strides = [1, 1, 1]} : vector<18x18x3xf32> to vector<16x16x3xf32>
    %8 = vector.extract_strided_slice %5 {offsets = [0, 2, 0], sizes = [16, 16, 3], strides = [1, 1, 1]} : vector<18x18x3xf32> to vector<16x16x3xf32>
    %9 = vector.extract_strided_slice %5 {offsets = [1, 0, 0], sizes = [16, 16, 3], strides = [1, 1, 1]} : vector<18x18x3xf32> to vector<16x16x3xf32>
    %10 = vector.extract_strided_slice %5 {offsets = [1, 1, 0], sizes = [16, 16, 3], strides = [1, 1, 1]} : vector<18x18x3xf32> to vector<16x16x3xf32>
    %11 = vector.extract_strided_slice %5 {offsets = [1, 2, 0], sizes = [16, 16, 3], strides = [1, 1, 1]} : vector<18x18x3xf32> to vector<16x16x3xf32>
    %12 = vector.extract_strided_slice %5 {offsets = [2, 0, 0], sizes = [16, 16, 3], strides = [1, 1, 1]} : vector<18x18x3xf32> to vector<16x16x3xf32>
    %13 = vector.extract_strided_slice %5 {offsets = [2, 1, 0], sizes = [16, 16, 3], strides = [1, 1, 1]} : vector<18x18x3xf32> to vector<16x16x3xf32>
    %14 = vector.extract_strided_slice %5 {offsets = [2, 2, 0], sizes = [16, 16, 3], strides = [1, 1, 1]} : vector<18x18x3xf32> to vector<16x16x3xf32>
    %15 = tpu.concatenate %6, %7, %8, %9, %10, %11, %12, %13, %14 in 2 : vector<16x16x3xf32>, vector<16x16x3xf32>, vector<16x16x3xf32>, vector<16x16x3xf32>, vector<16x16x3xf32>, vector<16x16x3xf32>, vector<16x16x3xf32>, vector<16x16x3xf32>, vector<16x16x3xf32> -> vector<16x16x27xf32>
    %16 = vector.shape_cast %15 : vector<16x16x27xf32> to vector<256x27xf32>
    %c0_4 = arith.constant 0 : index
    %c0_5 = arith.constant 0 : index
    %17 = vector.load %arg2[%c0_4, %c0_5] : memref<27x8xf32, #tpu.memory_space<vmem>>, vector<27x8xf32>
    %cst_6 = arith.constant dense<0.000000e+00> : vector<256x8xf32>
    %18 = tpu.matmul %16, %17, %cst_6 {dimension_numbers = #tpu.dot_dimension_numbers<[1], [0], [0], [1], [0, 0, 1, 1], [], []>} : vector<256x27xf32>, vector<27x8xf32>, vector<256x8xf32> -> vector<256x8xf32>
    %c0_7 = arith.constant 0 : index
    %c0_8 = arith.constant 0 : index
    %19 = vector.load %arg3[%c0_7, %c0_8] : memref<1x8xf32, #tpu.memory_space<vmem>>, vector<1x8xf32>
    %20 = vector.broadcast %19 : vector<1x8xf32> to vector<256x8xf32>
    %21 = arith.addf %18, %20 : vector<256x8xf32>
    %22 = vector.shape_cast %21 : vector<256x8xf32> to vector<16x16x8xf32>
    %c0_9 = arith.constant 0 : index
    %c0_10 = arith.constant 0 : index
    %c0_11 = arith.constant 0 : index
    %c0_12 = arith.constant 0 : index
    %23 = vector.load %arg4[%c0_9, %c0_10, %c0_11, %c0_12] : memref<1x16x16x8xf32, #tpu.memory_space<vmem>>, vector<1x16x16x8xf32>
    %24 = vector.shape_cast %23 : vector<1x16x16x8xf32> to vector<16x16x8xf32>
    %25 = vector.shape_cast %22 : vector<16x16x8xf32> to vector<1x16x16x8xf32>
    tpu.vector_store %arg4[%c0_9, %c0_10, %c0_11, %c0_12], %25 {strides = array<i32>} : memref<1x16x16x8xf32, #tpu.memory_space<vmem>>, vector<1x16x16x8xf32>,
    return
  }
  func.func @transform_0(%arg0: i32) -> (i32, i32, i32, i32) {
    %c0_i32 = arith.constant 0 : i32
    %c0_i32_0 = arith.constant 0 : i32
    %c0_i32_1 = arith.constant 0 : i32
    %c0_i32_2 = arith.constant 0 : i32
    return %arg0, %c0_i32, %c0_i32_0, %c0_i32_1 : i32, i32, i32, i32
  }
  func.func @transform_1(%arg0: i32) -> (i32, i32) {
    %c0_i32 = arith.constant 0 : i32
    %c0_i32_0 = arith.constant 0 : i32
    %c0_i32_1 = arith.constant 0 : i32
    return %c0_i32, %c0_i32_0 : i32, i32
  }
  func.func @transform_2(%arg0: i32) -> (i32, i32) {
    %c0_i32 = arith.constant 0 : i32
    %c0_i32_0 = arith.constant 0 : i32
    %c0_i32_1 = arith.constant 0 : i32
    return %c0_i32, %c0_i32_0 : i32, i32
  }
  func.func @transform_3(%arg0: i32) -> (i32, i32, i32, i32) {
    %c0_i32 = arith.constant 0 : i32
    %c0_i32_0 = arith.constant 0 : i32
    %c0_i32_1 = arith.constant 0 : i32
    %c0_i32_2 = arith.constant 0 : i32
    return %arg0, %c0_i32, %c0_i32_0, %c0_i32_1 : i32, i32, i32, i32
  }
}

</mosaic_0001>

<bundles_post_ra>
// kernel: tpu_custom_call.1
= control target key start
LH: loop header
LB: loop body
LE: loop exit
PB: predicated region body
PF: predicated region fallthrough
CT: control target
= control target key end

     0   :  { %s2259_s12 = smov 0   ;;  %s4069_s0 = inlined_call_operand.vmem [shape: f32[2,16,16,3], index: 0, kind: input, shape index: {}]   ;;  %s4070_s1 = inlined_call_operand.vmem [shape: f32[27,8], index: 1, kind: input, shape index: {}]   ;;  %s4071_s2 = inlined_call_operand.vmem [shape: f32[1,8], index: 2, kind: input, shape index: {}]   ;;  %s4072_s3 = inlined_call_operand.vmem [shape: f32[2,16,16,8], index: 3, kind: output, shape index: {}]  }
   0x1 LB: > { %s2033_s13 = sadd.s32 4294967295, %s2228_s12   ;;  %p2037_p0 = scmp.ge.s32.totalorder %s2228_s12, 1  ;;  %s2228_s12 = sphi %s2259_s12, %s13_s12  }
   0x2   : > { %p137_p1 = scmp.lt.s32.totalorder %s2228_s12, 3 }
   0x4   : > { %p138_p2 = pnand %p2037_p0, %p137_p1 }
   0x6   : > { %141 = sbr.rel (%p138_p2) target bundleno = 836 (0x344), region = 32 }
   0xb   : > { %vm236_vm0 = vcmask 1040384   ;;  %p161_p3 = scmp.lt.s32.totalorder %s2033_s13, 1  ;;  %v2230_v0 = vmov 0.0   ;;  %vm402_vm1 = vcmask 1046528   ;;  %s2231_s18 = smov 3   ;;  %vm579_vm2 = vcmask 1045504  }
   0xc   : > { %v2267_v1 = vrot.slane %v2230_v0, 7  ;;  %s2232_s19 = smov 6   ;;  %s2233_s20 = smov 9   ;;  %vm1344_vm3 = vcmask 23552   ;;  %vm1377_vm4 = vcmask 48128   ;;  %vm1716_vm5 = vcmask 1042432  }
   0xd   : > { %s4423_s13 = smov (!%p161_p3, %s2033_s13), 1  ;;  %s2234_s21 = smov 12   ;;  %vm1410_vm6 = vcmask 72704   ;;  %vm1443_vm7 = vcmask 97280   ;;  %vm1476_vm8 = vcmask 121856   ;;  %vm1509_vm9 = vcmask 146432  }
   0xe   : > { %4201 = vst [vmem:[#allocation2_spill] sm:$0xff] %v2267_v1  ;;  %v2273_v2 = vsel %vm236_vm0, 0.0, %v2267_v1  ;;  %v2277_v3 = vsel %vm236_vm0, %v2267_v1, 0.0  ;;  %v404_v4 = vrot.slane %v2267_v1, 1  ;;  %s2078_s14 = sshll.u32 %s4423_s13, 8  ;;  %s2235_s22 = smov 15  }
   0xf   : > { %4202 = vst [vmem:[#allocation3_spill] sm:$0xff] %v2273_v2  ;;  %v403_v5 = vrot.slane %v2273_v2, 1  ;;  %v406_v6 = vrot.slane %v2277_v3, 1  ;;  %s2288_s17 = scalar_lea.vmem %s4069_s0, %s2078_s14  ;;  %s2236_s23 = smov 18   ;;  %vm1542_vm10 = vcmask 171008   ;;  %vm1575_vm11 = vcmask 195584  }
  0x10   : > { %v171_v9 = vld [vmem:[%s2288_s17] sm:$0xff]  ;;  %v172_v10 = vld [vmem:[%s2288_s17 + $0x8] sm:$0xff]  ;;  %v173_v11 = vld [vmem:[%s2288_s17 + $0x10] sm:$0xff]  ;;  %s2237_s26 = smov 21   ;;  %s2238_s6 = smov 24   ;;  %vm1619_vm12 = vcmask 220160  }
  0x11   : > { %v405_v7 = vsel %vm402_vm1, %v403_v5, %v404_v4  ;;  %v407_v8 = vsel %vm402_vm1, %v404_v4, %v406_v6  ;;  %v239_v13 = vrot.slane %v171_v9, 7  ;;  %v240_v14 = vrot.slane %v172_v10, 7  ;;  %v174_v15 = vld [vmem:[%s2288_s17 + $0x18] sm:$0xff]  ;;  %v175_v16 = vld [vmem:[%s2288_s17 + $0x20] sm:$0xff]  ;;  %v176_v17 = vld [vmem:[%s2288_s17 + $0x28] sm:$0xff]  ;;  %s3907_s11 = scalar_lea.vmem %s4072_s3, %s2078_s14 }
  0x12   : > { %v2295_v12 = vpack.i.bf16 %v407_v8, %v405_v7  ;;  %v242_v18 = vrot.slane %v173_v11, 7  ;;  %v243_v19 = vrot.slane %v174_v15, 7  ;;  %v245_v20 = vrot.slane %v175_v16, 7  ;;  %v177_v22 = vld [vmem:[%s2288_s17 + $0x30] sm:$0xff]  ;;  %v178_v31 = vld [vmem:[%s2288_s17 + $0x38] sm:$0xff]  ;;  %v179_v40 = vld [vmem:[%s2288_s17 + $0x40] sm:$0xff] }
  0x13   : > { %v246_v21 = vrot.slane %v176_v17, 7  ;;  %v2304_v23 = vsel %vm236_vm0, %v239_v13, %v240_v14  ;;  %v2307_v24 = vsel %vm236_vm0, %v240_v14, 0.0  ;;  %v2310_v25 = vsel %vm236_vm0, 0.0, %v239_v13  ;;  %v180_v49 = vld [vmem:[%s2288_s17 + $0x48] sm:$0xff]  ;;  %v181_v50 = vld [vmem:[%s2288_s17 + $0x50] sm:$0xff]  ;;  %v182_v55 = vld [vmem:[%s2288_s17 + $0x58] sm:$0xff] }
  0x14   : > { %4203 = vst [vmem:[#allocation4_spill] sm:$0xff] %v2295_v12  ;;  %2198 = vrot.lane.b32.xlu0 %v2295_v12, %s2231_s18  ;;  %4204 = vst [vmem:[#allocation5_spill] sm:$0xff] %v2304_v23  ;;  %v248_v26 = vrot.slane %v177_v22, 7  ;;  %v409_v27 = vrot.slane %v2304_v23, 1  ;;  %v411_v28 = vrot.slane %v2307_v24, 1  ;;  %v408_v29 = vrot.slane %v2310_v25, 1 }
  0x15   : > { %4205 = vst [vmem:[#allocation6_spill] sm:$0xff] %v2310_v25  ;;  %v2316_v30 = vsel %vm236_vm0, %v242_v18, %v243_v19  ;;  %v2320_v32 = vsel %vm236_vm0, 0.0, %v242_v18  ;;  %v2324_v34 = vsel %vm236_vm0, %v243_v19, 0.0  ;;  %v2327_v35 = vsel %vm236_vm0, %v245_v20, %v246_v21  ;;  %v183_v4 = vld [vmem:[%s2288_s17 + $0x60] sm:$0xff]  ;;  %v184_v5 = vld [vmem:[%s2288_s17 + $0x68] sm:$0xff]  ;;  %v185_v19 = vld [vmem:[%s2288_s17 + $0x70] sm:$0xff] }
  0x16   : > { %v414_v33 = vrot.slane %v2316_v30, 1  ;;  %v2330_v36 = vsel %vm402_vm1, %v409_v27, %v411_v28  ;;  %v2333_v37 = vsel %vm402_vm1, %v408_v29, %v409_v27  ;;  %v413_v38 = vrot.slane %v2320_v32, 1  ;;  %v193_v12 = vld [vmem:[%s2288_s17 + $0xb0] sm:$0xff] }
  0x17   : > { %v416_v39 = vrot.slane %v2324_v34, 1  ;;  %489 = vrot.lane.b32.xlu1 %v2330_v36, %s2231_s18  ;;  %v2343_v41 = vsel %vm236_vm0, 0.0, %v245_v20  ;;  %v419_v42 = vrot.slane %v2327_v35, 1  ;;  %v2347_v43 = vsel %vm236_vm0, %v246_v21, 0.0  ;;  %v186_v20 = vld [vmem:[%s2288_s17 + $0x78] sm:$0xff] }
  0x18   : > { %487 = vrot.lane.b32.xlu0 %v2333_v37, %s2231_s18  ;;  %v249_v44 = vrot.slane %v178_v31, 7  ;;  %v2350_v45 = vsel %vm402_vm1, %v413_v38, %v414_v33  ;;  %v418_v47 = vrot.slane %v2343_v41, 1  ;;  %v421_v48 = vrot.slane %v2347_v43, 1 }
  0x19   : > { %v2353_v46 = vsel %vm402_vm1, %v414_v33, %v416_v39  ;;  %v2363_v52 = vsel %vm236_vm0, 0.0, %v248_v26  ;;  %v251_v54 = vrot.slane %v179_v40, 7  ;;  %v252_v58 = vrot.slane %v180_v49, 7  ;;  %v187_v39 = vld [vmem:[%s2288_s17 + $0x80] sm:$0xff]  ;;  %v188_v40 = vld [vmem:[%s2288_s17 + $0x88] sm:$0xff] }
  0x1a   : > { %v2360_v51 = vsel %vm236_vm0, %v248_v26, %v249_v44  ;;  %v2366_v53 = vsel %vm236_vm0, %v249_v44, 0.0  ;;  %v2370_v56 = vsel %vm402_vm1, %v418_v47, %v419_v42  ;;  %v2377_v57 = vsel %vm402_vm1, %v419_v42, %v421_v48 }
  0x1b   : > { %491 = vrot.lane.b32.xlu1 %v2350_v45, %s2231_s18  ;;  %v2380_v59 = vsel %vm236_vm0, 0.0, %v251_v54  ;;  %v254_v60 = vrot.slane %v181_v50, 7  ;;  %v423_v61 = vrot.slane %v2363_v52, 1  ;;  %v424_v62 = vrot.slane %v2360_v51, 1 }
  0x1c   : > { %493 = vrot.lane.b32.xlu0 %v2353_v46, %s2231_s18  ;;  %v426_v63 = vrot.slane %v2366_v53, 1  ;;  %v255_v0 = vrot.slane %v182_v55, 7  ;;  %v2388_v6 = vsel %vm236_vm0, %v251_v54, %v252_v58  ;;  %v2391_v7 = vsel %vm236_vm0, %v252_v58, 0.0  ;;  %v189_v54 = vld [vmem:[%s2288_s17 + $0x90] sm:$0xff] }
  0x1d   : > { %v428_v8 = vrot.slane %v2380_v59, 1  ;;  %v429_v9 = vrot.slane %v2388_v6, 1  ;;  %v2400_v10 = vsel %vm236_vm0, 0.0, %v254_v60  ;;  %v257_v11 = vrot.slane %v183_v4, 7 }
  0x1e   : > { %v258_v13 = vrot.slane %v184_v5, 7  ;;  %v2403_v14 = vsel %vm402_vm1, %v423_v61, %v424_v62  ;;  %v2406_v15 = vsel %vm402_vm1, %v424_v62, %v426_v63  ;;  %v431_v16 = vrot.slane %v2391_v7, 1  ;;  %v190_v63 = vld [vmem:[%s2288_s17 + $0x98] sm:$0xff] }
  0x1f   : > { %495 = vrot.lane.b32.xlu1 %v2370_v56, %s2231_s18  ;;  %4206 = vst [vmem:[#allocation7_spill] sm:$0xff] %v2406_v15  ;;  %v2410_v17 = vsel %vm236_vm0, %v254_v60, %v255_v0  ;;  %v2413_v18 = vsel %vm236_vm0, %v255_v0, 0.0  ;;  %v433_v21 = vrot.slane %v2400_v10, 1  ;;  %v2423_v22 = vsel %vm402_vm1, %v428_v8, %v429_v9 }
  0x20   : > { %497 = vrot.lane.b32.xlu0 %v2377_v57, %s2231_s18  ;;  %4207 = vst [vmem:[#allocation8_spill] sm:$0xff] %v2423_v22  ;;  %v434_v26 = vrot.slane %v2410_v17, 1  ;;  %v2427_v27 = vsel %vm236_vm0, %v257_v11, %v258_v13  ;;  %v2430_v28 = vsel %vm236_vm0, 0.0, %v257_v11  ;;  %v2433_v29 = vsel %vm402_vm1, %v429_v9, %v431_v16 }
  0x21   : > { %4208 = vst [vmem:[#allocation9_spill] sm:$0xff] %v2427_v27  ;;  %4209 = vst [vmem:[#allocation10_spill] sm:$0xff] %v2430_v28  ;;  %v436_v31 = vrot.slane %v2413_v18, 1  ;;  %v260_v33 = vrot.slane %v185_v19, 7  ;;  %v261_v38 = vrot.slane %v186_v20, 7  ;;  %v2439_v42 = vsel %vm236_vm0, %v258_v13, 0.0 }
  0x22   : > { %4210 = vst [vmem:[#allocation11_spill] sm:$0xff] %v2433_v29  ;;  %v438_v44 = vrot.slane %v2430_v28, 1  ;;  %v439_v47 = vrot.slane %v2427_v27, 1  ;;  %v2448_v48 = vsel %vm402_vm1, %v433_v21, %v434_v26  ;;  %v263_v49 = vrot.slane %v187_v39, 7  ;;  %v191_v21 = vld [vmem:[%s2288_s17 + $0xa0] sm:$0xff] }
  0x23   : > { %499 = vrot.lane.b32.xlu1 %v2403_v14, %s2231_s18  ;;  %4211 = vst [vmem:[#allocation12_spill] sm:$0xff] %v2448_v48  ;;  %v264_v50 = vrot.slane %v188_v40, 7  ;;  %v2452_v55 = vsel %vm402_vm1, %v434_v26, %v436_v31  ;;  %v441_v58 = vrot.slane %v2439_v42, 1  ;;  %v2456_v60 = vsel %vm236_vm0, %v260_v33, %v261_v38  ;;  %v192_v26 = vld [vmem:[%s2288_s17 + $0xa8] sm:$0xff] }
  0x24   : > { %501 = vrot.lane.b32.xlu0 %v2406_v15, %s2231_s18  ;;  %4212 = vst [vmem:[#allocation13_spill] sm:$0xff] %v2452_v55  ;;  %4213 = vst [vmem:[#allocation14_spill] sm:$0xff] %v2456_v60  ;;  %v2459_v61 = vsel %vm236_vm0, 0.0, %v260_v33  ;;  %v2462_v62 = vsel %vm236_vm0, %v261_v38, 0.0  ;;  %v2466_v0 = vsel %vm402_vm1, %v438_v44, %v439_v47  ;;  %v266_v4 = vrot.slane %v189_v54, 7 }
  0x25   : > { %4214 = vst [vmem:[#allocation15_spill] sm:$0xff] %v2459_v61  ;;  %4215 = vst [vmem:[#allocation16_spill] sm:$0xff] %v2466_v0  ;;  %v443_v5 = vrot.slane %v2459_v61, 1  ;;  %v444_v8 = vrot.slane %v2456_v60, 1  ;;  %v2475_v9 = vsel %vm236_vm0, %v263_v49, %v264_v50  ;;  %v2478_v11 = vsel %vm236_vm0, 0.0, %v263_v49 }
  0x26   : > { %4216 = vst [vmem:[#allocation17_spill] sm:$0xff] %v2475_v9  ;;  %4217 = vst [vmem:[#allocation18_spill] sm:$0xff] %v2478_v11  ;;  %v2481_v13 = vsel %vm402_vm1, %v439_v47, %v441_v58  ;;  %v446_v16 = vrot.slane %v2462_v62, 1  ;;  %v2485_v19 = vsel %vm236_vm0, %v264_v50, 0.0  ;;  %v267_v20 = vrot.slane %v190_v63, 7 }
  0x27   : > { %503 = vrot.lane.b32.xlu1 %v2423_v22, %s2231_s18  ;;  %4218 = vst [vmem:[#allocation19_spill] sm:$0xff] %v2481_v13  ;;  %v581_v31 = vrot.slane %v2267_v1, 2  ;;  %v583_v33 = vrot.slane %v2277_v3, 2  ;;  %v448_v38 = vrot.slane %v2478_v11, 1  ;;  %v449_v39 = vrot.slane %v2475_v9, 1 }
  0x28   : > { %505 = vrot.lane.b32.xlu0 %v2433_v29, %s2231_s18  ;;  %v580_v40 = vrot.slane %v2273_v2, 2  ;;  %v2499_v44 = vsel %vm402_vm1, %v443_v5, %v444_v8  ;;  %v451_v47 = vrot.slane %v2485_v19, 1  ;;  %v2503_v49 = vsel %vm236_vm0, 0.0, %v266_v4  ;;  %v194_v5 = vld [vmem:[%s2288_s17 + $0xb8] sm:$0xff]  ;;  %v200_v29 = vld [vmem:[%s2288_s17 + $0xe8] sm:$0xff] }
  0x29   : > { %4219 = vst [vmem:[#allocation20_spill] sm:$0xff] %v2499_v44  ;;  %v269_v3 = vrot.slane %v191_v21, 7  ;;  %v2506_v50 = vsel %vm402_vm1, %v444_v8, %v446_v16  ;;  %v2509_v54 = vsel %vm236_vm0, %v266_v4, %v267_v20  ;;  %v2512_v58 = vsel %vm236_vm0, %v267_v20, 0.0 }
  0x2a   : > { %4220 = vst [vmem:[#allocation21_spill] sm:$0xff] %v2506_v50  ;;  %v270_v63 = vrot.slane %v192_v26, 7  ;;  %v2517_v1 = vsel %vm402_vm1, %v448_v38, %v449_v39  ;;  %v453_v2 = vrot.slane %v2503_v49, 1  ;;  %v582_v21 = vsel %vm579_vm2, %v580_v40, %v581_v31 }
  0x2b   : > { %507 = vrot.lane.b32.xlu1 %v2448_v48, %s2231_s18  ;;  %4221 = vst [vmem:[#allocation22_spill] sm:$0xff] %v2517_v1  ;;  %v584_v8 = vsel %vm579_vm2, %v581_v31, %v583_v33  ;;  %v2527_v4 = vsel %vm402_vm1, %v449_v39, %v451_v47  ;;  %v454_v16 = vrot.slane %v2509_v54, 1  ;;  %v456_v20 = vrot.slane %v2512_v58, 1  ;;  %v199_v48 = vld [vmem:[%s2288_s17 + $0xe0] sm:$0xff] }
  0x2c   : > { %509 = vrot.lane.b32.xlu0 %v2452_v55, %s2231_s18  ;;  %4222 = vst [vmem:[#allocation23_spill] sm:$0xff] %v2527_v4  ;;  %v2532_v26 = vsel %vm236_vm0, 0.0, %v269_v3  ;;  %v2535_v38 = vsel %vm236_vm0, %v269_v3, %v270_v63  ;;  %v2538_v31 = vsel %vm236_vm0, %v270_v63, 0.0  ;;  %v272_v33 = vrot.slane %v193_v12, 7 }
  0x2d   : > { %v273_v40 = vrot.slane %v194_v5, 7  ;;  %v2541_v39 = vpack.i.bf16 %v584_v8, %v582_v21  ;;  %v458_v47 = vrot.slane %v2532_v26, 1  ;;  %v2550_v3 = vsel %vm402_vm1, %v453_v2, %v454_v16 }
  0x2e   : > { %4224 = vst [vmem:[#allocation25_spill] sm:$0xff] %v2550_v3  ;;  %v2553_v12 = vsel %vm402_vm1, %v454_v16, %v456_v20  ;;  %v459_v63 = vrot.slane %v2535_v38, 1  ;;  %v461_v5 = vrot.slane %v2538_v31, 1  ;;  %v2561_v8 = vsel %vm236_vm0, 0.0, %v272_v33  ;;  %v198_v16 = vld [vmem:[%s2288_s17 + $0xd8] sm:$0xff] }
  0x2f   : > { %511 = vrot.lane.b32.xlu1 %v2466_v0, %s2231_s18  ;;  %4223 = vst [vmem:[#allocation24_spill] sm:$0xff] %v2541_v39  ;;  %4225 = vst [vmem:[#allocation26_spill] sm:$0xff] %v2553_v12  ;;  %v2558_v21 = vsel %vm236_vm0, %v272_v33, %v273_v40  ;;  %v463_v33 = vrot.slane %v2561_v8, 1  ;;  %vm1945_vm13 = vcmask 64512  }
  0x30   : > { %513 = vrot.lane.b32.xlu0 %v2481_v13, %s2231_s18  ;;  %v197_v13 = vld [vmem:[%s2288_s17 + $0xd0] sm:$0xff]  ;;  %v2573_v20 = vsel %vm402_vm1, %v458_v47, %v459_v63  ;;  %v464_v0 = vrot.slane %v2558_v21, 1 }
  0x31   : > { %4226 = vst [vmem:[#allocation27_spill] sm:$0xff] %v2573_v20  ;;  %v278_v55 = vrot.slane %v197_v13, 7 }
  0x33   : > { %515 = vrot.lane.b32.xlu1 %v2499_v44, %s2231_s18  ;;  %v196_v44 = vld [vmem:[%s2288_s17 + $0xc8] sm:$0xff] }
  0x34   : > { %517 = vrot.lane.b32.xlu0 %v2506_v50, %s2231_s18  ;;  %v195_v50 = vld [vmem:[%s2288_s17 + $0xc0] sm:$0xff]  ;;  %v276_v2 = vrot.slane %v196_v44, 7  ;;  %v2579_v44 = vsel %vm402_vm1, %v459_v63, %v461_v5  ;;  %v2597_v63 = vsel %vm402_vm1, %v463_v33, %v464_v0  ;;  %v282_v33 = vrot.slane %v200_v29, 7 }
  0x35   : > { %4227 = vst [vmem:[#allocation28_spill] sm:$0xff] %v2579_v44  ;;  %4228 = vst [vmem:[#allocation29_spill] sm:$0xff] %v2597_v63 }
  0x36   : > { %v2589_v47 = vsel %vm236_vm0, %v276_v2, 0.0 }
  0x37   : > { %519 = vrot.lane.b32.xlu1 %v2517_v1, %s2231_s18  ;;  %v2564_v1 = vsel %vm236_vm0, %v273_v40, 0.0 }
  0x38   : > { %521 = vrot.lane.b32.xlu0 %v2527_v4, %s2231_s18  ;;  %v275_v4 = vrot.slane %v195_v50, 7  ;;  %v466_v40 = vrot.slane %v2564_v1, 1 }
  0x3a   : > { %v2582_v50 = vsel %vm236_vm0, 0.0, %v275_v4  ;;  %v2600_v13 = vsel %vm402_vm1, %v464_v0, %v466_v40 }
  0x3b   : > { %523 = vrot.lane.b32.xlu1 %v2550_v3, %s2231_s18  ;;  %v279_v3 = vrot.slane %v198_v16, 7  ;;  %4229 = vst [vmem:[#allocation30_spill] sm:$0xff] %v2600_v13  ;;  %v468_v5 = vrot.slane %v2582_v50, 1 }
  0x3c   : > { %525 = vrot.lane.b32.xlu0 %v2553_v12, %s2231_s18  ;;  %v2586_v12 = vsel %vm236_vm0, %v275_v4, %v276_v2  ;;  %v281_v4 = vrot.slane %v199_v48, 7  ;;  %v471_v2 = vrot.slane %v2589_v47, 1 }
  0x3d   : > { %v469_v16 = vrot.slane %v2586_v12, 1  ;;  %v2606_v22 = vsel %vm236_vm0, %v278_v55, %v279_v3 }
  0x3e   : > { %v474_v0 = vrot.slane %v2606_v22, 1  ;;  %v2628_v29 = vsel %vm236_vm0, 0.0, %v281_v4 }
  0x3f   : > { %527 = vrot.lane.b32.xlu1 %v2573_v20, %s2231_s18  ;;  %v2609_v20 = vsel %vm236_vm0, 0.0, %v278_v55  ;;  %v2621_v40 = vsel %vm402_vm1, %v468_v5, %v469_v16  ;;  %v2624_v55 = vsel %vm402_vm1, %v469_v16, %v471_v2  ;;  %4232 = vst [vmem:[#allocation33_spill] sm:$0xff] %v2628_v29  ;;  %v478_v5 = vrot.slane %v2628_v29, 1 }
  0x40   : > { %529 = vrot.lane.b32.xlu0 %v2579_v44, %s2231_s18  ;;  %v2612_v44 = vsel %vm236_vm0, %v279_v3, 0.0  ;;  %v473_v48 = vrot.slane %v2609_v20, 1  ;;  %4230 = vst [vmem:[#allocation31_spill] sm:$0xff] %v2621_v40  ;;  %4231 = vst [vmem:[#allocation32_spill] sm:$0xff] %v2624_v55 }
  0x41   : > { %v476_v3 = vrot.slane %v2612_v44, 1 }
  0x42   : > { %v2642_v16 = vsel %vm402_vm1, %v473_v48, %v474_v0  ;;  %v585_v48 = vrot.slane %v2310_v25, 2 }
  0x43   : > { %531 = vrot.lane.b32.xlu1 %v2597_v63, %s2231_s18  ;;  %v2631_v63 = vsel %vm236_vm0, %v281_v4, %v282_v33  ;;  %4233 = vst [vmem:[#allocation34_spill] sm:$0xff] %v2642_v16  ;;  %v2645_v2 = vsel %vm402_vm1, %v474_v0, %v476_v3  ;;  %v586_v0 = vrot.slane %v2304_v23, 2 }
  0x44   : > { %533 = vrot.lane.b32.xlu0 %v2600_v13, %s2231_s18  ;;  %v2634_v13 = vsel %vm236_vm0, %v282_v33, 0.0  ;;  %4234 = vst [vmem:[#allocation35_spill] sm:$0xff] %v2645_v2  ;;  %v479_v4 = vrot.slane %v2631_v63, 1 }
  0x45   : > { %v481_v15 = vrot.slane %v2634_v13, 1  ;;  %v2666_v3 = vsel %vm579_vm2, %v585_v48, %v586_v0 }
  0x46   : > { %v2654_v33 = vsel %vm402_vm1, %v478_v5, %v479_v4  ;;  %v590_v5 = vrot.slane %v2320_v32, 2 }
  0x47   : > { %535 = vrot.lane.b32.xlu1 %v2621_v40, %s2231_s18  ;;  %4235 = vst [vmem:[#allocation36_spill] sm:$0xff] %v2654_v33  ;;  %v608_v40 = vrot.slane %v2391_v7, 2 }
  0x48   : > { %537 = vrot.lane.b32.xlu0 %v2624_v55, %s2231_s18  ;;  %v2657_v55 = vsel %vm402_vm1, %v479_v4, %v481_v15  ;;  %v591_v15 = vrot.slane %v2316_v30, 2  ;;  %v593_v4 = vrot.slane %v2324_v34, 2 }
  0x49   : > { %4236 = vst [vmem:[#allocation37_spill] sm:$0xff] %v2657_v55 }
  0x4a   : > { %v2680_v48 = vsel %vm579_vm2, %v590_v5, %v591_v15  ;;  %v601_v5 = vrot.slane %v2360_v51, 2 }
  0x4b   : > { %539 = vrot.lane.b32.xlu1 %v2642_v16, %s2231_s18  ;;  %4237 = vst [vmem:[#allocation38_spill] sm:$0xff] %v2680_v48  ;;  %v603_v16 = vrot.slane %v2366_v53, 2 }
  0x4c   : > { %541 = vrot.lane.b32.xlu0 %v2645_v2, %s2231_s18  ;;  %v588_v2 = vrot.slane %v2307_v24, 2  ;;  %v595_v24 = vrot.slane %v2343_v41, 2 }
  0x4d   : > { %v2716_v53 = vsel %vm579_vm2, %v601_v5, %v603_v16 }
  0x4e   : > { %4242 = vst [vmem:[#allocation43_spill] sm:$0xff] %v2716_v53 }
  0x4f   : > { %543 = vrot.lane.b32.xlu1 %v2654_v33, %s2231_s18  ;;  %v596_v33 = vrot.slane %v2327_v35, 2 }
  0x50   : > { %545 = vrot.lane.b32.xlu0 %v2657_v55, %s2231_s18  ;;  %v2677_v55 = vsel %vm579_vm2, %v586_v0, %v588_v2  ;;  %v598_v2 = vrot.slane %v2347_v43, 2  ;;  %v600_v0 = vrot.slane %v2363_v52, 2  ;;  %v605_v43 = vrot.slane %v2380_v59, 2 }
  0x51   : > { %v2692_v34 = vsel %vm579_vm2, %v595_v24, %v596_v33  ;;  %v606_v24 = vrot.slane %v2388_v6, 2 }
  0x52   : > { %4239 = vst [vmem:[#allocation40_spill] sm:$0xff] %v2692_v34 }
  0x53   : > { %2203 = vrot.lane.b32.xlu1 %v2541_v39, %s2232_s19  ;;  %v2689_v39 = vsel %vm579_vm2, %v591_v15, %v593_v4  ;;  %v2703_v15 = vsel %vm579_vm2, %v596_v33, %v598_v2  ;;  %v2706_v4 = vsel %vm579_vm2, %v600_v0, %v601_v5  ;;  %v2719_v33 = vsel %vm579_vm2, %v605_v43, %v606_v24 }
  0x54   : > { %664 = vrot.lane.b32.xlu0 %v2666_v3, %s2232_s19  ;;  %4238 = vst [vmem:[#allocation39_spill] sm:$0xff] %v2689_v39  ;;  %4240 = vst [vmem:[#allocation41_spill] sm:$0xff] %v2703_v15  ;;  %v610_v2 = vrot.slane %v2400_v10, 2  ;;  %v611_v0 = vrot.slane %v2410_v17, 2  ;;  %v2729_v7 = vsel %vm579_vm2, %v606_v24, %v608_v40  ;;  %v615_v5 = vrot.slane %v2430_v28, 2 }
  0x55   : > { %4241 = vst [vmem:[#allocation42_spill] sm:$0xff] %v2706_v4  ;;  %4243 = vst [vmem:[#allocation44_spill] sm:$0xff] %v2719_v33  ;;  %v616_v43 = vrot.slane %v2427_v27, 2  ;;  %v618_v40 = vrot.slane %v2439_v42, 2  ;;  %v620_v24 = vrot.slane %v2459_v61, 2  ;;  %v625_v42 = vrot.slane %v2478_v11, 2 }
  0x56   : > { %4244 = vst [vmem:[#allocation45_spill] sm:$0xff] %v2729_v7  ;;  %v2732_v16 = vsel %vm579_vm2, %v610_v2, %v611_v0  ;;  %v621_v2 = vrot.slane %v2456_v60, 2 }
  0x57   : > { %666 = vrot.lane.b32.xlu1 %v2677_v55, %s2232_s19  ;;  %4245 = vst [vmem:[#allocation46_spill] sm:$0xff] %v2732_v16 }
  0x58   : > { %668 = vrot.lane.b32.xlu0 %v2680_v48, %s2232_s19  ;;  %v2982_v48 = vld [vmem:[%s2288_s17 + $0xf8] sm:$0xff] }
  0x59   : > { %4277 = vst [vmem:[#allocation78_spill] sm:$0xff] %v2982_v48 }
  0x5b   : > { %670 = vrot.lane.b32.xlu1 %v2689_v39, %s2232_s19 }
  0x5c   : > { %672 = vrot.lane.b32.xlu0 %v2692_v34, %s2232_s19  ;;  %v201_v34 = vld [vmem:[%s2288_s17 + $0xf0] sm:$0xff] }
  0x5f   : > { %674 = vrot.lane.b32.xlu1 %v2703_v15, %s2232_s19 }
  0x60   : > { %676 = vrot.lane.b32.xlu0 %v2706_v4, %s2232_s19  ;;  %v613_v4 = vrot.slane %v2413_v18, 2  ;;  %v2744_v18 = vsel %vm579_vm2, %v615_v5, %v616_v43  ;;  %v626_v5 = vrot.slane %v2475_v9, 2 }
  0x61   : > { %4247 = vst [vmem:[#allocation48_spill] sm:$0xff] %v2744_v18 }
  0x63   : > { %678 = vrot.lane.b32.xlu1 %v2716_v53, %s2232_s19 }
  0x64   : > { %680 = vrot.lane.b32.xlu0 %v2719_v33, %s2232_s19  ;;  %v2741_v33 = vsel %vm579_vm2, %v611_v0, %v613_v4  ;;  %v2755_v4 = vsel %vm579_vm2, %v616_v43, %v618_v40  ;;  %v2758_v0 = vsel %vm579_vm2, %v620_v24, %v621_v2  ;;  %v2771_v43 = vsel %vm579_vm2, %v625_v42, %v626_v5 }
  0x65   : > { %4246 = vst [vmem:[#allocation47_spill] sm:$0xff] %v2741_v33  ;;  %4248 = vst [vmem:[#allocation49_spill] sm:$0xff] %v2755_v4  ;;  %v630_v40 = vrot.slane %v2503_v49, 2  ;;  %v631_v24 = vrot.slane %v2509_v54, 2  ;;  %v636_v42 = vrot.slane %v2535_v38, 2 }
  0x66   : > { %4249 = vst [vmem:[#allocation50_spill] sm:$0xff] %v2758_v0  ;;  %4251 = vst [vmem:[#allocation52_spill] sm:$0xff] %v2771_v43 }
  0x67   : > { %682 = vrot.lane.b32.xlu1 %v2729_v7, %s2232_s19  ;;  %v653_v7 = vrot.slane %v2612_v44, 2 }
  0x68   : > { %684 = vrot.lane.b32.xlu0 %v2732_v16, %s2232_s19  ;;  %v623_v16 = vrot.slane %v2462_v62, 2 }
  0x6a   : > { %v2768_v62 = vsel %vm579_vm2, %v621_v2, %v623_v16  ;;  %v2784_v16 = vsel %vm579_vm2, %v630_v40, %v631_v24  ;;  %v635_v2 = vrot.slane %v2532_v26, 2  ;;  %v641_v40 = vrot.slane %v2558_v21, 2 }
  0x6b   : > { %686 = vrot.lane.b32.xlu1 %v2741_v33, %s2232_s19  ;;  %4250 = vst [vmem:[#allocation51_spill] sm:$0xff] %v2768_v62  ;;  %4253 = vst [vmem:[#allocation54_spill] sm:$0xff] %v2784_v16  ;;  %v648_v33 = vrot.slane %v2589_v47, 2 }
  0x6c   : > { %688 = vrot.lane.b32.xlu0 %v2744_v18, %s2232_s19  ;;  %v628_v18 = vrot.slane %v2485_v19, 2 }
  0x6e   : > { %v2781_v19 = vsel %vm579_vm2, %v626_v5, %v628_v18  ;;  %v638_v18 = vrot.slane %v2538_v31, 2  ;;  %v640_v5 = vrot.slane %v2561_v8, 2  ;;  %v645_v31 = vrot.slane %v2582_v50, 2 }
  0x6f   : > { %690 = vrot.lane.b32.xlu1 %v2755_v4, %s2232_s19  ;;  %4252 = vst [vmem:[#allocation53_spill] sm:$0xff] %v2781_v19  ;;  %v643_v4 = vrot.slane %v2564_v1, 2 }
  0x70   : > { %692 = vrot.lane.b32.xlu0 %v2758_v0, %s2232_s19  ;;  %v633_v0 = vrot.slane %v2512_v58, 2  ;;  %v2796_v58 = vsel %vm579_vm2, %v635_v2, %v636_v42  ;;  %v646_v2 = vrot.slane %v2586_v12, 2 }
  0x71   : > { %4255 = vst [vmem:[#allocation56_spill] sm:$0xff] %v2796_v58  ;;  %v2820_v1 = vsel %vm579_vm2, %v641_v40, %v643_v4 }
  0x72   : > { %4258 = vst [vmem:[#allocation59_spill] sm:$0xff] %v2820_v1  ;;  %v2833_v47 = vsel %vm579_vm2, %v646_v2, %v648_v33 }
  0x73   : > { %694 = vrot.lane.b32.xlu1 %v2768_v62, %s2232_s19  ;;  %v2793_v62 = vsel %vm579_vm2, %v631_v24, %v633_v0  ;;  %v2807_v0 = vsel %vm579_vm2, %v636_v42, %v638_v18  ;;  %v2810_v24 = vsel %vm579_vm2, %v640_v5, %v641_v40  ;;  %v2823_v42 = vsel %vm579_vm2, %v645_v31, %v646_v2 }
  0x74   : > { %696 = vrot.lane.b32.xlu0 %v2771_v43, %s2232_s19  ;;  %4254 = vst [vmem:[#allocation55_spill] sm:$0xff] %v2793_v62  ;;  %4256 = vst [vmem:[#allocation57_spill] sm:$0xff] %v2807_v0  ;;  %v650_v18 = vrot.slane %v2609_v20, 2  ;;  %v651_v5 = vrot.slane %v2606_v22, 2  ;;  %v655_v40 = vrot.slane %v2628_v29, 2  ;;  %v656_v31 = vrot.slane %v2631_v63, 2 }
  0x75   : > { %4257 = vst [vmem:[#allocation58_spill] sm:$0xff] %v2810_v24  ;;  %4259 = vst [vmem:[#allocation60_spill] sm:$0xff] %v2823_v42  ;;  %v658_v2 = vrot.slane %v2634_v13, 2 }
  0x76   : > { %4260 = vst [vmem:[#allocation61_spill] sm:$0xff] %v2833_v47  ;;  %v2836_v4 = vsel %vm579_vm2, %v650_v18, %v651_v5  ;;  %v2847_v44 = vsel %vm579_vm2, %v651_v5, %v653_v7  ;;  %v2850_v33 = vsel %vm579_vm2, %v655_v40, %v656_v31 }
  0x77   : > { %698 = vrot.lane.b32.xlu1 %v2781_v19, %s2232_s19  ;;  %4261 = vst [vmem:[#allocation62_spill] sm:$0xff] %v2836_v4  ;;  %4263 = vst [vmem:[#allocation64_spill] sm:$0xff] %v2847_v44 }
  0x78   : > { %700 = vrot.lane.b32.xlu0 %v2784_v16, %s2232_s19  ;;  %4264 = vst [vmem:[#allocation65_spill] sm:$0xff] %v2850_v33 }
  0x7b   : > { %702 = vrot.lane.b32.xlu1 %v2793_v62, %s2232_s19  ;;  %v284_v62 = vrot.slane %v201_v34, 7 }
  0x7c   : > { %704 = vrot.lane.b32.xlu0 %v2796_v58, %s2232_s19 }
  0x7f   : > { %706 = vrot.lane.b32.xlu1 %v2807_v0, %s2232_s19 }
  0x80   : > { %708 = vrot.lane.b32.xlu0 %v2810_v24, %s2232_s19 }
  0x83   : > { %710 = vrot.lane.b32.xlu1 %v2820_v1, %s2232_s19 }
  0x84   : > { %712 = vrot.lane.b32.xlu0 %v2823_v42, %s2232_s19 }
  0x86   : > { %v2840_v53 = vpop.permute.xlu0 %2198 }
  0x87   : > { %4262 = vst [vmem:[#allocation63_spill] sm:$0xff] %v2840_v53  ;;  %714 = vrot.lane.b32.xlu1 %v2833_v47, %s2232_s19 }
  0x88   : > { %716 = vrot.lane.b32.xlu0 %v2836_v4, %s2232_s19  ;;  %v2862_v4 = vsel %vm579_vm2, %v656_v31, %v658_v2 }
  0x89   : > { %v2853_v18 = vpop.permute.xlu1 %489  ;;  %4267 = vst [vmem:[#allocation68_spill] sm:$0xff] %v2862_v4 }
  0x8a   : > { %4265 = vst [vmem:[#allocation66_spill] sm:$0xff] %v2853_v18  ;;  %v2855_v42 = vpop.permute.xlu0 %487 }
  0x8b   : > { %4266 = vst [vmem:[#allocation67_spill] sm:$0xff] %v2855_v42  ;;  %718 = vrot.lane.b32.xlu1 %v2847_v44, %s2232_s19 }
  0x8c   : > { %720 = vrot.lane.b32.xlu0 %v2850_v33, %s2232_s19 }
  0x8d   : > { %v2864_v7 = vpop.permute.xlu1 %491 }
  0x8e   : > { %v2866_v5 = vpop.permute.xlu0 %493  ;;  %v1349_v34 = vsel %vm1344_vm3, %v2320_v32, %v2864_v7 }
  0x8f   : > { %722 = vrot.lane.b32.xlu1 %v2862_v4, %s2232_s19  ;;  %v1350_v7 = vsel %vm1344_vm3, %v2316_v30, %v2866_v5 }
  0x90   : > { %757 = vrot.lane.b32.xlu0 %v2310_v25, %s2233_s20 }
  0x91   : > { %v2872_v13 = vpop.permute.xlu1 %495 }
  0x92   : > { %v2874_v40 = vpop.permute.xlu0 %497 }
  0x93   : > { %759 = vrot.lane.b32.xlu1 %v2304_v23, %s2233_s20 }
  0x94   : > { %761 = vrot.lane.b32.xlu0 %v2320_v32, %s2233_s20 }
  0x95   : > { %v2880_v31 = vpop.permute.xlu1 %499 }
  0x96   : > { %v2882_v2 = vpop.permute.xlu0 %501  ;;  %v1353_v5 = vsel %vm1344_vm3, %v2363_v52, %v2880_v31 }
  0x97   : > { %763 = vrot.lane.b32.xlu1 %v2316_v30, %s2233_s20 }
  0x98   : > { %765 = vrot.lane.b32.xlu0 %v2343_v41, %s2233_s20 }
  0x99   : > { %v2888_v4 = vpop.permute.xlu1 %503 }
  0x9a   : > { %v2890_v33 = vpop.permute.xlu0 %505 }
  0x9b   : > { %767 = vrot.lane.b32.xlu1 %v2327_v35, %s2233_s20 }
  0x9c   : > { %769 = vrot.lane.b32.xlu0 %v2363_v52, %s2233_s20 }
  0x9d   : > { %v2896_v44 = vpop.permute.xlu1 %507 }
  0x9e   : > { %v2898_v23 = vpop.permute.xlu0 %509 }
  0x9f   : > { %771 = vrot.lane.b32.xlu1 %v2360_v51, %s2233_s20 }
  0xa0   : > { %773 = vrot.lane.b32.xlu0 %v2380_v59, %s2233_s20 }
  0xa1   : > { %v2904_v18 = vpop.permute.xlu1 %511 }
  0xa2   : > { %v2906_v25 = vpop.permute.xlu0 %513 }
  0xa3   : > { %775 = vrot.lane.b32.xlu1 %v2388_v6, %s2233_s20 }
  0xa4   : > { %777 = vrot.lane.b32.xlu0 %v2400_v10, %s2233_s20 }
  0xa5   : > { %v2912_v42 = vpop.permute.xlu1 %515 }
  0xa6   : > { %4268 = vst [vmem:[#allocation69_spill] sm:$0xff] %v2912_v42  ;;  %v2914_v47 = vpop.permute.xlu0 %517 }
  0xa7   : > { %4269 = vst [vmem:[#allocation70_spill] sm:$0xff] %v2914_v47  ;;  %779 = vrot.lane.b32.xlu1 %v2410_v17, %s2233_s20 }
  0xa8   : > { %781 = vrot.lane.b32.xlu0 %v2430_v28, %s2233_s20 }
  0xa9   : > { %v2920_v53 = vpop.permute.xlu1 %519 }
  0xaa   : > { %4270 = vst [vmem:[#allocation71_spill] sm:$0xff] %v2920_v53  ;;  %v2922_v1 = vpop.permute.xlu0 %521 }
  0xab   : > { %4271 = vst [vmem:[#allocation72_spill] sm:$0xff] %v2922_v1  ;;  %783 = vrot.lane.b32.xlu1 %v2427_v27, %s2233_s20 }
  0xac   : > { %785 = vrot.lane.b32.xlu0 %v2459_v61, %s2233_s20 }
  0xad   : > { %v2928_v24 = vpop.permute.xlu1 %523 }
  0xae   : > { %v2930_v42 = vpop.permute.xlu0 %525 }
  0xaf   : > { %787 = vrot.lane.b32.xlu1 %v2456_v60, %s2233_s20 }
  0xb0   : > { %789 = vrot.lane.b32.xlu0 %v2478_v11, %s2233_s20 }
  0xb1   : > { %v2936_v47 = vpop.permute.xlu1 %527 }
  0xb2   : > { %v2938_v53 = vpop.permute.xlu0 %529 }
  0xb3   : > { %791 = vrot.lane.b32.xlu1 %v2475_v9, %s2233_s20 }
  0xb4   : > { %793 = vrot.lane.b32.xlu0 %v2503_v49, %s2233_s20 }
  0xb5   : > { %v2944_v1 = vpop.permute.xlu1 %531 }
  0xb6   : > { %v2946_v61 = vpop.permute.xlu0 %533 }
  0xb7   : > { %795 = vrot.lane.b32.xlu1 %v2509_v54, %s2233_s20 }
  0xb8   : > { %797 = vrot.lane.b32.xlu0 %v2532_v26, %s2233_s20 }
  0xb9   : > { %v2952_v11 = vpop.permute.xlu1 %535 }
  0xba   : > { %v2954_v60 = vpop.permute.xlu0 %537 }
  0xbb   : > { %799 = vrot.lane.b32.xlu1 %v2535_v38, %s2233_s20 }
  0xbc   : > { %801 = vrot.lane.b32.xlu0 %v2561_v8, %s2233_s20 }
  0xbd   : > { %v2960_v9 = vpop.permute.xlu1 %539 }
  0xbe   : > { %v2962_v0 = vpop.permute.xlu0 %541 }
  0xbf   : > { %4272 = vst [vmem:[#allocation73_spill] sm:$0xff] %v2962_v0  ;;  %803 = vrot.lane.b32.xlu1 %v2558_v21, %s2233_s20 }
  0xc0   : > { %805 = vrot.lane.b32.xlu0 %v2582_v50, %s2233_s20 }
  0xc1   : > { %v2968_v15 = vpop.permute.xlu1 %543 }
  0xc2   : > { %4273 = vst [vmem:[#allocation74_spill] sm:$0xff] %v2968_v15  ;;  %v2970_v58 = vpop.permute.xlu0 %545  ;;  %v4193_v15 = vrot.slane %v2982_v48, 7  ;;  %v4287_v48 = vld [vmem:[#allocation13_spill] sm:$0xff] }
  0xc3   : > { %4274 = vst [vmem:[#allocation75_spill] sm:$0xff] %v2970_v58  ;;  %807 = vrot.lane.b32.xlu1 %v2586_v12, %s2233_s20  ;;  %v2989_v58 = vsel %vm236_vm0, 0.0, %v284_v62 }
  0xc4   : > { %809 = vrot.lane.b32.xlu0 %v2609_v20, %s2233_s20  ;;  %4278 = vst [vmem:[#allocation79_spill] sm:$0xff] %v2989_v58 }
  0xc5   : > { %v2977_v39 = vpop.permute.xlu1 %2203 }
  0xc6   : > { %4275 = vst [vmem:[#allocation76_spill] sm:$0xff] %v2977_v39  ;;  %v2979_v16 = vpop.permute.xlu0 %664 }
  0xc7   : > { %4276 = vst [vmem:[#allocation77_spill] sm:$0xff] %v2979_v16  ;;  %811 = vrot.lane.b32.xlu1 %v2606_v22, %s2233_s20 }
  0xc8   : > { %813 = vrot.lane.b32.xlu0 %v2628_v29, %s2233_s20  ;;  %v3007_v29 = vsel %vm236_vm0, %v284_v62, %v4193_v15  ;;  %v1352_v62 = vsel %vm1344_vm3, %v2327_v35, %v2874_v40  ;;  %v1355_v40 = vsel %vm1344_vm3, %v2380_v59, %v2888_v4  ;;  %v1357_v4 = vsel %vm1344_vm3, %v2400_v10, %v2896_v44 }
  0xc9   : > { %v2995_v16 = vpop.permute.xlu1 %666  ;;  %4281 = vst [vmem:[#allocation82_spill] sm:$0xff] %v3007_v29  ;;  %v1359_v44 = vsel %vm1344_vm3, %v2430_v28, %v2904_v18  ;;  %v4290_v28 = vld [vmem:[#allocation19_spill] sm:$0xff] }
  0xca   : > { %4279 = vst [vmem:[#allocation80_spill] sm:$0xff] %v2995_v16  ;;  %v669_v39 = vpop.permute.xlu0 %668 }
  0xcb   : > { %v2998_v0 = vsel %vm1377_vm4, %v1349_v34, %v669_v39  ;;  %815 = vrot.lane.b32.xlu1 %v2631_v63, %s2233_s20  ;;  %v1351_v39 = vsel %vm1344_vm3, %v2343_v41, %v2872_v13 }
  0xcc   : > { %4280 = vst [vmem:[#allocation81_spill] sm:$0xff] %v2998_v0  ;;  %817 = vrot.lane.b32.xlu0 %v2989_v58, %s2233_s20 }
  0xcd   : > { %v671_v34 = vpop.permute.xlu1 %670 }
  0xce   : > { %v673_v16 = vpop.permute.xlu0 %672  ;;  %v3016_v0 = vsel %vm1377_vm4, %v1350_v7, %v671_v34 }
  0xcf   : > { %v3019_v58 = vsel %vm1377_vm4, %v1351_v39, %v673_v16  ;;  %819 = vrot.lane.b32.xlu1 %v3007_v29, %s2233_s20 }
  0xd0   : > { %859 = vrot.lane.b32.xlu0 %v2333_v37, %s2234_s21  ;;  %v1354_v37 = vsel %vm1344_vm3, %v2360_v51, %v2882_v2 }
  0xd1   : > { %v675_v13 = vpop.permute.xlu1 %674 }
  0xd2   : > { %v677_v7 = vpop.permute.xlu0 %676  ;;  %v3032_v16 = vsel %vm1377_vm4, %v1352_v62, %v675_v13 }
  0xd3   : > { %v3035_v39 = vsel %vm1377_vm4, %v1353_v5, %v677_v7  ;;  %861 = vrot.lane.b32.xlu1 %v2330_v36, %s2234_s21  ;;  %v1356_v36 = vsel %vm1344_vm3, %v2388_v6, %v2890_v33  ;;  %v1358_v33 = vsel %vm1344_vm3, %v2410_v17, %v2898_v23  ;;  %v1360_v23 = vsel %vm1344_vm3, %v2427_v27, %v2906_v25  ;;  %v4288_v25 = vld [vmem:[#allocation16_spill] sm:$0xff] }
  0xd4   : > { %863 = vrot.lane.b32.xlu0 %v2350_v45, %s2234_s21 }
  0xd5   : > { %v679_v31 = vpop.permute.xlu1 %678 }
  0xd6   : > { %v681_v34 = vpop.permute.xlu0 %680  ;;  %v3048_v62 = vsel %vm1377_vm4, %v1354_v37, %v679_v31 }
  0xd7   : > { %v3051_v5 = vsel %vm1377_vm4, %v1355_v40, %v681_v34  ;;  %865 = vrot.lane.b32.xlu1 %v2353_v46, %s2234_s21 }
  0xd8   : > { %867 = vrot.lane.b32.xlu0 %v2370_v56, %s2234_s21 }
  0xd9   : > { %v683_v2 = vpop.permute.xlu1 %682 }
  0xda   : > { %v685_v13 = vpop.permute.xlu0 %684  ;;  %v3064_v7 = vsel %vm1377_vm4, %v1356_v36, %v683_v2  ;;  %v4283_v2 = vld [vmem:[#allocation8_spill] sm:$0xff] }
  0xdb   : > { %v3067_v37 = vsel %vm1377_vm4, %v1357_v4, %v685_v13  ;;  %869 = vrot.lane.b32.xlu1 %v2377_v57, %s2234_s21  ;;  %v4282_v4 = vld [vmem:[#allocation7_spill] sm:$0xff] }
  0xdc   : > { %871 = vrot.lane.b32.xlu0 %v2403_v14, %s2234_s21 }
  0xdd   : > { %v687_v40 = vpop.permute.xlu1 %686 }
  0xde   : > { %v689_v31 = vpop.permute.xlu0 %688  ;;  %v3080_v34 = vsel %vm1377_vm4, %v1358_v33, %v687_v40  ;;  %v4284_v33 = vld [vmem:[#allocation11_spill] sm:$0xff] }
  0xdf   : > { %v3083_v36 = vsel %vm1377_vm4, %v1359_v44, %v689_v31  ;;  %873 = vrot.lane.b32.xlu1 %v4282_v4, %s2234_s21  ;;  %v4285_v44 = vld [vmem:[#allocation12_spill] sm:$0xff] }
  0xe0   : > { %875 = vrot.lane.b32.xlu0 %v4283_v2, %s2234_s21 }
  0xe1   : > { %v691_v13 = vpop.permute.xlu1 %690 }
  0xe2   : > { %v3092_v18 = vpop.permute.xlu0 %692  ;;  %v3095_v15 = vsel %vm1377_vm4, %v1360_v23, %v691_v13  ;;  %v1365_v23 = vsel %vm1344_vm3, %v2503_v49, %v2928_v24  ;;  %v1367_v24 = vsel %vm1344_vm3, %v2532_v26, %v2936_v47  ;;  %v1369_v47 = vsel %vm1344_vm3, %v2561_v8, %v2944_v1 }
  0xe3   : > { %877 = vrot.lane.b32.xlu1 %v4284_v33, %s2234_s21  ;;  %v1371_v1 = vsel %vm1344_vm3, %v2582_v50, %v2952_v11  ;;  %v1373_v11 = vsel %vm1344_vm3, %v2609_v20, %v2960_v9  ;;  %v4296_v9 = vld [vmem:[#allocation74_spill] sm:$0xff] }
  0xe4   : > { %879 = vrot.lane.b32.xlu0 %v4285_v44, %s2234_s21 }
  0xe5   : > { %v3101_v40 = vpop.permute.xlu1 %694 }
  0xe6   : > { %v3103_v31 = vpop.permute.xlu0 %696 }
  0xe7   : > { %4286 = vst [vmem:[#allocation7_spill] sm:$0xff] %v3103_v31  ;;  %881 = vrot.lane.b32.xlu1 %v4287_v48, %s2234_s21  ;;  %v4291_v31 = vld [vmem:[#allocation20_spill] sm:$0xff] }
  0xe8   : > { %883 = vrot.lane.b32.xlu0 %v4288_v25, %s2234_s21  ;;  %v1366_v25 = vsel %vm1344_vm3, %v2509_v54, %v2930_v42  ;;  %v1368_v42 = vsel %vm1344_vm3, %v2535_v38, %v2938_v53  ;;  %v1370_v53 = vsel %vm1344_vm3, %v2558_v21, %v2946_v61  ;;  %v1372_v61 = vsel %vm1344_vm3, %v2586_v12, %v2954_v60  ;;  %v4295_v60 = vld [vmem:[#allocation73_spill] sm:$0xff] }
  0xe9   : > { %v3112_v13 = vpop.permute.xlu1 %698 }
  0xea   : > { %4289 = vst [vmem:[#allocation8_spill] sm:$0xff] %v3112_v13  ;;  %v701_v29 = vpop.permute.xlu0 %700 }
  0xeb   : > { %v3115_v27 = vsel %vm1377_vm4, %v1365_v23, %v701_v29  ;;  %885 = vrot.lane.b32.xlu1 %v4290_v28, %s2234_s21  ;;  %v4292_v23 = vld [vmem:[#allocation21_spill] sm:$0xff] }
  0xec   : > { %887 = vrot.lane.b32.xlu0 %v4291_v31, %s2234_s21  ;;  %v4293_v31 = vld [vmem:[#allocation22_spill] sm:$0xff] }
  0xed   : > { %v703_v48 = vpop.permute.xlu1 %702 }
  0xee   : > { %v705_v13 = vpop.permute.xlu0 %704  ;;  %v3128_v44 = vsel %vm1377_vm4, %v1366_v25, %v703_v48 }
  0xef   : > { %v3131_v29 = vsel %vm1377_vm4, %v1367_v24, %v705_v13  ;;  %889 = vrot.lane.b32.xlu1 %v4292_v23, %s2234_s21  ;;  %v4294_v24 = vld [vmem:[#allocation23_spill] sm:$0xff] }
  0xf0   : > { %891 = vrot.lane.b32.xlu0 %v4293_v31, %s2234_s21 }
  0xf1   : > { %v707_v28 = vpop.permute.xlu1 %706 }
  0xf2   : > { %v709_v48 = vpop.permute.xlu0 %708  ;;  %v3144_v25 = vsel %vm1377_vm4, %v1368_v42, %v707_v28 }
  0xf3   : > { %v3147_v13 = vsel %vm1377_vm4, %v1369_v47, %v709_v48  ;;  %893 = vrot.lane.b32.xlu1 %v4294_v24, %s2234_s21 }
  0xf4   : > { %960 = vrot.lane.b32.xlu0 %v2666_v3, %s2235_s22 }
  0xf5   : > { %v711_v28 = vpop.permute.xlu1 %710 }
  0xf6   : > { %v713_v42 = vpop.permute.xlu0 %712  ;;  %v3160_v47 = vsel %vm1377_vm4, %v1370_v53, %v711_v28 }
  0xf7   : > { %v3163_v48 = vsel %vm1377_vm4, %v1371_v1, %v713_v42  ;;  %992 = vrot.lane.b32.xlu1 %v2771_v43, %s2235_s22  ;;  %v4297_v42 = vld [vmem:[#allocation33_spill] sm:$0xff] }
  0xf8   : > { %962 = vrot.lane.b32.xlu0 %v2677_v55, %s2235_s22  ;;  %v1374_v55 = vsel %vm1344_vm3, %v2606_v22, %v4295_v60  ;;  %v1375_v43 = vsel %vm1344_vm3, %v4297_v42, %v4296_v9 }
  0xf9   : > { %v715_v3 = vpop.permute.xlu1 %714 }
  0xfa   : > { %v717_v53 = vpop.permute.xlu0 %716  ;;  %v3176_v28 = vsel %vm1377_vm4, %v1372_v61, %v715_v3 }
  0xfb   : > { %v3179_v1 = vsel %vm1377_vm4, %v1373_v11, %v717_v53  ;;  %994 = vrot.lane.b32.xlu1 %v2781_v19, %s2235_s22 }
  0xfc   : > { %1056 = vrot.lane.b32.xlu0 %v2320_v32, %s2236_s23  ;;  %v4298_v32 = vld [vmem:[#allocation75_spill] sm:$0xff] }
  0xfd   : > { %v719_v61 = vpop.permute.xlu1 %718  ;;  %v1376_v60 = vsel %vm1344_vm3, %v2631_v63, %v4298_v32 }
  0xfe   : > { %v721_v3 = vpop.permute.xlu0 %720  ;;  %v3192_v11 = vsel %vm1377_vm4, %v1374_v55, %v719_v61  ;;  %v1611_v55 = vld [vmem:[%s4070_s1 + $0x18] sm:$0x7] }
  0xff   : > { %v3195_v53 = vsel %vm1377_vm4, %v1375_v43, %v721_v3  ;;  %1088 = vrot.lane.b32.xlu1 %v2503_v49, %s2236_s23  ;;  %2116 = vmatprep.subr.msk.mxu0 %vm1716_vm5, %v1611_v55 }
 0x100   : > { %1058 = vrot.lane.b32.xlu0 %v2316_v30, %s2236_s23  ;;  %2172 = vmatprep.subr.msk.mxu1 %vm1716_vm5, %v1611_v55  ;;  %v1610_v30 = vld [vmem:[%s4070_s1 + $0x10] sm:$0xff] }
 0x101   : > { %v723_v19 = vpop.permute.xlu1 %722  ;;  %2117 = vmatpush3.msk.msra.mxu0 %vm1716_vm5, %v1611_v55  ;;  %2176 = vmatpush3.msk.msra.mxu1 %vm1716_vm5, %v1611_v55 }
 0x102   : > { %v3204_v9 = vpop.permute.xlu0 %757  ;;  %v3210_v43 = vsel %vm1377_vm4, %v1376_v60, %v723_v19  ;;  %2118 = vmatprep.subr.mxu0 %v1610_v30  ;;  %2173 = vmatprep.subr.mxu1 %v1610_v30  ;;  %v1608_v19 = vld [vmem:[%s4070_s1] sm:$0xff]  ;;  %v4300_v60 = vld [vmem:[#allocation81_spill] sm:$0xff] }
 0x103   : > { %1090 = vrot.lane.b32.xlu1 %v2509_v54, %s2236_s23  ;;  %2119 = vmatpush3.msra.mxu0 %v1610_v30  ;;  %v1609_v54 = vld [vmem:[%s4070_s1 + $0x8] sm:$0xff] }
 0x104   : > { %1152 = vrot.lane.b32.xlu0 %v2350_v45, %s2237_s26  ;;  %2177 = vmatpush3.msra.mxu1 %v1610_v30  ;;  %v4299_v45 = vld [vmem:[#allocation25_spill] sm:$0xff]  ;;  %v4301_v30 = vld [vmem:[#allocation26_spill] sm:$0xff] }
 0x105   : > { %v3219_v49 = vpop.permute.xlu1 %759  ;;  %2120 = vmatprep.subr.mxu0 %v1609_v54  ;;  %2174 = vmatprep.subr.mxu1 %v1609_v54 }
 0x106   : > { %v3221_v61 = vpop.permute.xlu0 %761  ;;  %2121 = vmatpush3.msra.mxu0 %v1609_v54  ;;  %2178 = vmatpush3.msra.mxu1 %v1609_v54 }
 0x107   : > { %1184 = vrot.lane.b32.xlu1 %v4299_v45, %s2237_s26  ;;  %2122 = vmatprep.subr.mxu0 %v1608_v19 }
 0x108   : > { %895 = vrot.lane.b32.xlu0 %v4299_v45, %s2234_s21  ;;  %2175 = vmatprep.subr.mxu1 %v1608_v19 }
 0x109   : > { %v3233_v3 = vpop.permute.xlu1 %763  ;;  %2123 = vmatpush3.msra.mxu0 %v1608_v19  ;;  %2179 = vmatpush3.msra.mxu1 %v1608_v19 }
 0x10a   : > { %v766_v32 = vpop.permute.xlu0 %765 }
 0x10b   : > { %v3237_v55 = vsel %vm1410_vm6, %v4300_v60, %v766_v32  ;;  %1154 = vrot.lane.b32.xlu1 %v2353_v46, %s2237_s26  ;;  %v4302_v32 = vld [vmem:[#allocation38_spill] sm:$0xff] }
 0x10c   : > { %1186 = vrot.lane.b32.xlu0 %v4301_v30, %s2237_s26  ;;  %v4303_v46 = vld [vmem:[#allocation54_spill] sm:$0xff] }
 0x10d   : > { %v768_v45 = vpop.permute.xlu1 %767 }
 0x10e   : > { %v770_v24 = vpop.permute.xlu0 %769  ;;  %v3245_v31 = vsel %vm1410_vm6, %v3016_v0, %v768_v45 }
 0x10f   : > { %v3249_v54 = vsel %vm1410_vm6, %v3019_v58, %v770_v24  ;;  %1248 = vrot.lane.b32.xlu1 %v4302_v32, %s2238_s6 }
 0x110   : > { %1280 = vrot.lane.b32.xlu0 %v4303_v46, %s2238_s6 }
 0x111   : > { %v772_v60 = vpop.permute.xlu1 %771 }
 0x112   : > { %v774_v23 = vpop.permute.xlu0 %773  ;;  %v3257_v19 = vsel %vm1410_vm6, %v3032_v16, %v772_v60  ;;  %v4310_v60 = vld [vmem:[#allocation55_spill] sm:$0xff] }
 0x113   : > { %v3261_v0 = vsel %vm1410_vm6, %v3035_v39, %v774_v23  ;;  %897 = vrot.lane.b32.xlu1 %v4301_v30, %s2234_s21  ;;  %v4307_v39 = vld [vmem:[#allocation39_spill] sm:$0xff] }
 0x114   : > { %4304 = vst [vmem:[#allocation11_spill] sm:$0xff] %v3261_v0  ;;  %964 = vrot.lane.b32.xlu0 %v4302_v32, %s2235_s22 }
 0x115   : > { %v776_v58 = vpop.permute.xlu1 %775 }
 0x116   : > { %v778_v24 = vpop.permute.xlu0 %777  ;;  %v3269_v45 = vsel %vm1410_vm6, %v3048_v62, %v776_v58 }
 0x117   : > { %4305 = vst [vmem:[#allocation73_spill] sm:$0xff] %v3269_v45  ;;  %v3273_v16 = vsel %vm1410_vm6, %v3051_v5, %v778_v24  ;;  %996 = vrot.lane.b32.xlu1 %v4303_v46, %s2235_s22 }
 0x118   : > { %4306 = vst [vmem:[#allocation74_spill] sm:$0xff] %v3273_v16  ;;  %1250 = vrot.lane.b32.xlu0 %v4307_v39, %s2238_s6  ;;  %v4348_v16 = vld [vmem:[#allocation44_spill] sm:$0xff] }
 0x119   : > { %v780_v23 = vpop.permute.xlu1 %779 }
 0x11a   : > { %v782_v30 = vpop.permute.xlu0 %781  ;;  %v3281_v32 = vsel %vm1410_vm6, %v3064_v7, %v780_v23 }
 0x11b   : > { %4308 = vst [vmem:[#allocation33_spill] sm:$0xff] %v3281_v32  ;;  %v3285_v62 = vsel %vm1410_vm6, %v3067_v37, %v782_v30  ;;  %1282 = vrot.lane.b32.xlu1 %v4310_v60, %s2238_s6  ;;  %v4346_v32 = vld [vmem:[#allocation15_spill] sm:$0xff] }
 0x11c   : > { %4309 = vst [vmem:[#allocation75_spill] sm:$0xff] %v3285_v62  ;;  %966 = vrot.lane.b32.xlu0 %v4307_v39, %s2235_s22 }
 0x11d   : > { %v784_v5 = vpop.permute.xlu1 %783 }
 0x11e   : > { %v786_v46 = vpop.permute.xlu0 %785  ;;  %v3293_v58 = vsel %vm1410_vm6, %v3080_v34, %v784_v5 }
 0x11f   : > { %4311 = vst [vmem:[#allocation25_spill] sm:$0xff] %v3293_v58  ;;  %v3297_v7 = vsel %vm1410_vm6, %v3083_v36, %v786_v46  ;;  %998 = vrot.lane.b32.xlu1 %v4310_v60, %s2235_s22  ;;  %v4342_v58 = vld [vmem:[#allocation63_spill] sm:$0xff] }
 0x120   : > { %4312 = vst [vmem:[#allocation81_spill] sm:$0xff] %v3297_v7  ;;  %1060 = vrot.lane.b32.xlu0 %v2343_v41, %s2236_s23  ;;  %v4340_v7 = vld [vmem:[#allocation59_spill] sm:$0xff] }
 0x121   : > { %v788_v37 = vpop.permute.xlu1 %787 }
 0x122   : > { %v3303_v24 = vpop.permute.xlu0 %789  ;;  %v3307_v39 = vsel %vm1410_vm6, %v3095_v15, %v788_v37  ;;  %v4317_v37 = vld [vmem:[#allocation40_spill] sm:$0xff] }
 0x123   : > { %4313 = vst [vmem:[#allocation26_spill] sm:$0xff] %v3307_v39  ;;  %1092 = vrot.lane.b32.xlu1 %v2532_v26, %s2236_s23  ;;  %v4314_v26 = vld [vmem:[#allocation27_spill] sm:$0xff] }
 0x124   : > { %1062 = vrot.lane.b32.xlu0 %v2327_v35, %s2236_s23 }
 0x125   : > { %v3313_v34 = vpop.permute.xlu1 %791 }
 0x126   : > { %v3315_v36 = vpop.permute.xlu0 %793 }
 0x127   : > { %1094 = vrot.lane.b32.xlu1 %v2535_v38, %s2236_s23 }
 0x128   : > { %1156 = vrot.lane.b32.xlu0 %v2370_v56, %s2237_s26 }
 0x129   : > { %v3321_v41 = vpop.permute.xlu1 %795 }
 0x12a   : > { %v798_v15 = vpop.permute.xlu0 %797 }
 0x12b   : > { %v3325_v23 = vsel %vm1410_vm6, %v3115_v27, %v798_v15  ;;  %1188 = vrot.lane.b32.xlu1 %v4314_v26, %s2237_s26  ;;  %v4315_v27 = vld [vmem:[#allocation28_spill] sm:$0xff] }
 0x12c   : > { %899 = vrot.lane.b32.xlu0 %v4314_v26, %s2234_s21 }
 0x12d   : > { %v800_v35 = vpop.permute.xlu1 %799 }
 0x12e   : > { %v802_v30 = vpop.permute.xlu0 %801  ;;  %v3333_v38 = vsel %vm1410_vm6, %v3128_v44, %v800_v35 }
 0x12f   : > { %v3337_v56 = vsel %vm1410_vm6, %v3131_v29, %v802_v30  ;;  %1158 = vrot.lane.b32.xlu1 %v2377_v57, %s2237_s26  ;;  %v4318_v29 = vld [vmem:[#allocation56_spill] sm:$0xff] }
 0x130   : > { %1190 = vrot.lane.b32.xlu0 %v4315_v27, %s2237_s26 }
 0x131   : > { %v804_v60 = vpop.permute.xlu1 %803 }
 0x132   : > { %v806_v5 = vpop.permute.xlu0 %805  ;;  %v3345_v46 = vsel %vm1410_vm6, %v3144_v25, %v804_v60 }
 0x133   : > { %v3349_v44 = vsel %vm1410_vm6, %v3147_v13, %v806_v5  ;;  %1252 = vrot.lane.b32.xlu1 %v4317_v37, %s2238_s6 }
 0x134   : > { %4316 = vst [vmem:[#allocation38_spill] sm:$0xff] %v3349_v44  ;;  %1284 = vrot.lane.b32.xlu0 %v4318_v29, %s2238_s6 }
 0x135   : > { %v808_v57 = vpop.permute.xlu1 %807 }
 0x136   : > { %v810_v15 = vpop.permute.xlu0 %809  ;;  %v3357_v26 = vsel %vm1410_vm6, %v3160_v47, %v808_v57 }
 0x137   : > { %4319 = vst [vmem:[#allocation54_spill] sm:$0xff] %v3357_v26  ;;  %v3361_v25 = vsel %vm1410_vm6, %v3163_v48, %v810_v15  ;;  %901 = vrot.lane.b32.xlu1 %v4315_v27, %s2234_s21  ;;  %v4323_v48 = vld [vmem:[#allocation41_spill] sm:$0xff] }
 0x138   : > { %4320 = vst [vmem:[#allocation39_spill] sm:$0xff] %v3361_v25  ;;  %968 = vrot.lane.b32.xlu0 %v4317_v37, %s2235_s22  ;;  %v4326_v37 = vld [vmem:[#allocation57_spill] sm:$0xff] }
 0x139   : > { %v812_v13 = vpop.permute.xlu1 %811 }
 0x13a   : > { %v814_v35 = vpop.permute.xlu0 %813  ;;  %v3369_v30 = vsel %vm1410_vm6, %v3176_v28, %v812_v13 }
 0x13b   : > { %4321 = vst [vmem:[#allocation55_spill] sm:$0xff] %v3369_v30  ;;  %v3373_v47 = vsel %vm1410_vm6, %v3179_v1, %v814_v35  ;;  %1000 = vrot.lane.b32.xlu1 %v4318_v29, %s2235_s22  ;;  %v4328_v35 = vld [vmem:[#allocation29_spill] sm:$0xff] }
 0x13c   : > { %4322 = vst [vmem:[#allocation27_spill] sm:$0xff] %v3373_v47  ;;  %1254 = vrot.lane.b32.xlu0 %v4323_v48, %s2238_s6  ;;  %v4345_v30 = vld [vmem:[#allocation69_spill] sm:$0xff] }
 0x13d   : > { %v816_v27 = vpop.permute.xlu1 %815 }
 0x13e   : > { %v818_v60 = vpop.permute.xlu0 %817  ;;  %v3381_v5 = vsel %vm1410_vm6, %v3192_v11, %v816_v27  ;;  %v4332_v27 = vld [vmem:[#allocation42_spill] sm:$0xff] }
 0x13f   : > { %4324 = vst [vmem:[#allocation28_spill] sm:$0xff] %v3381_v5  ;;  %v3385_v28 = vsel %vm1410_vm6, %v3195_v53, %v818_v60  ;;  %1286 = vrot.lane.b32.xlu1 %v4326_v37, %s2238_s6  ;;  %v4333_v60 = vld [vmem:[#allocation58_spill] sm:$0xff]  ;;  %v4341_v5 = vld [vmem:[#allocation31_spill] sm:$0xff] }
 0x140   : > { %4325 = vst [vmem:[#allocation40_spill] sm:$0xff] %v3385_v28  ;;  %970 = vrot.lane.b32.xlu0 %v4323_v48, %s2235_s22 }
 0x141   : > { %v820_v1 = vpop.permute.xlu1 %819 }
 0x142   : > { %v3391_v29 = vpop.permute.xlu0 %859  ;;  %v3395_v57 = vsel %vm1410_vm6, %v3210_v43, %v820_v1 }
 0x143   : > { %4327 = vst [vmem:[#allocation56_spill] sm:$0xff] %v3395_v57  ;;  %1002 = vrot.lane.b32.xlu1 %v4326_v37, %s2235_s22  ;;  %v4338_v57 = vld [vmem:[#allocation43_spill] sm:$0xff] }
 0x144   : > { %1064 = vrot.lane.b32.xlu0 %v2363_v52, %s2236_s23 }
 0x145   : > { %v3401_v11 = vpop.permute.xlu1 %861 }
 0x146   : > { %v3403_v53 = vpop.permute.xlu0 %863 }
 0x147   : > { %1096 = vrot.lane.b32.xlu1 %v2561_v8, %s2236_s23 }
 0x148   : > { %1066 = vrot.lane.b32.xlu0 %v2360_v51, %s2236_s23 }
 0x149   : > { %v3409_v15 = vpop.permute.xlu1 %865 }
 0x14a   : > { %v3411_v43 = vpop.permute.xlu0 %867 }
 0x14b   : > { %1098 = vrot.lane.b32.xlu1 %v2558_v21, %s2236_s23  ;;  %v4329_v21 = vld [vmem:[#allocation30_spill] sm:$0xff] }
 0x14c   : > { %1160 = vrot.lane.b32.xlu0 %v2403_v14, %s2237_s26 }
 0x14d   : > { %v3417_v52 = vpop.permute.xlu1 %869 }
 0x14e   : > { %v3419_v13 = vpop.permute.xlu0 %871 }
 0x14f   : > { %1192 = vrot.lane.b32.xlu1 %v4328_v35, %s2237_s26 }
 0x150   : > { %903 = vrot.lane.b32.xlu0 %v4328_v35, %s2234_s21 }
 0x151   : > { %v3425_v51 = vpop.permute.xlu1 %873 }
 0x152   : > { %v3427_v8 = vpop.permute.xlu0 %875 }
 0x153   : > { %1162 = vrot.lane.b32.xlu1 %v4282_v4, %s2237_s26 }
 0x154   : > { %1194 = vrot.lane.b32.xlu0 %v4329_v21, %s2237_s26 }
 0x155   : > { %v3433_v14 = vpop.permute.xlu1 %877 }
 0x156   : > { %4330 = vst [vmem:[#allocation41_spill] sm:$0xff] %v3433_v14  ;;  %v3435_v48 = vpop.permute.xlu0 %879 }
 0x157   : > { %4331 = vst [vmem:[#allocation57_spill] sm:$0xff] %v3435_v48  ;;  %1256 = vrot.lane.b32.xlu1 %v4332_v27, %s2238_s6 }
 0x158   : > { %1288 = vrot.lane.b32.xlu0 %v4333_v60, %s2238_s6 }
 0x159   : > { %v3441_v37 = vpop.permute.xlu1 %881 }
 0x15a   : > { %4334 = vst [vmem:[#allocation29_spill] sm:$0xff] %v3441_v37  ;;  %v3443_v1 = vpop.permute.xlu0 %883  ;;  %v4347_v37 = vld [vmem:[#allocation3_spill] sm:$0xff] }
 0x15b   : > { %4335 = vst [vmem:[#allocation30_spill] sm:$0xff] %v3443_v1  ;;  %905 = vrot.lane.b32.xlu1 %v4329_v21, %s2234_s21 }
 0x15c   : > { %972 = vrot.lane.b32.xlu0 %v4332_v27, %s2235_s22 }
 0x15d   : > { %v3449_v4 = vpop.permute.xlu1 %885 }
 0x15e   : > { %4336 = vst [vmem:[#allocation42_spill] sm:$0xff] %v3449_v4  ;;  %v3451_v35 = vpop.permute.xlu0 %887  ;;  %v2200_v4 = vunpack.i.l.bf16 %v4342_v58 }
 0x15f   : > { %4337 = vst [vmem:[#allocation58_spill] sm:$0xff] %v3451_v35  ;;  %1004 = vrot.lane.b32.xlu1 %v4333_v60, %s2235_s22 }
 0x160   : > { %1258 = vrot.lane.b32.xlu0 %v4338_v57, %s2238_s6  ;;  %v1345_v25 = vsel %vm1344_vm3, %v4347_v37, %v2200_v4 }
 0x161   : > { %v3457_v28 = vpop.permute.xlu1 %889 }
 0x162   : > { %4339 = vst [vmem:[#allocation43_spill] sm:$0xff] %v3457_v28  ;;  %v892_v39 = vpop.permute.xlu0 %891 }
 0x163   : > { %1290 = vrot.lane.b32.xlu1 %v4340_v7, %s2238_s6 }
 0x164   : > { %974 = vrot.lane.b32.xlu0 %v4338_v57, %s2235_s22 }
 0x165   : > { %v3463_v21 = vpop.permute.xlu1 %893 }
 0x166   : > { %v961_v27 = vpop.permute.xlu0 %960 }
 0x167   : > { %1006 = vrot.lane.b32.xlu1 %v4340_v7, %s2235_s22 }
 0x168   : > { %1068 = vrot.lane.b32.xlu0 %v2380_v59, %s2236_s23 }
 0x169   : > { %v993_v60 = vpop.permute.xlu1 %992 }
 0x16a   : > { %v3469_v35 = vpop.permute.xlu0 %962 }
 0x16b   : > { %1100 = vrot.lane.b32.xlu1 %v2582_v50, %s2236_s23 }
 0x16c   : > { %1070 = vrot.lane.b32.xlu0 %v2388_v6, %s2236_s23 }
 0x16d   : > { %v3475_v28 = vpop.permute.xlu1 %994 }
 0x16e   : > { %v1057_v57 = vpop.permute.xlu0 %1056 }
 0x16f   : > { %1102 = vrot.lane.b32.xlu1 %v2586_v12, %s2236_s23  ;;  %v4343_v12 = vld [vmem:[#allocation32_spill] sm:$0xff] }
 0x170   : > { %1164 = vrot.lane.b32.xlu0 %v4283_v2, %s2237_s26  ;;  %v4344_v2 = vld [vmem:[#allocation76_spill] sm:$0xff] }
 0x171   : > { %v1089_v7 = vpop.permute.xlu1 %1088  ;;  %v2205_v47 = vunpack.i.l.bf16 %v4344_v2 }
 0x172   : > { %v1059_v59 = vpop.permute.xlu0 %1058 }
 0x173   : > { %1196 = vrot.lane.b32.xlu1 %v4341_v5, %s2237_s26  ;;  %v1378_v26 = vsel %vm1377_vm4, %v1345_v25, %v2205_v47 }
 0x174   : > { %907 = vrot.lane.b32.xlu0 %v4341_v5, %s2234_s21  ;;  %v1361_v5 = vsel %vm1344_vm3, %v4346_v32, %v4345_v30  ;;  %v1411_v45 = vsel %vm1410_vm6, %v1378_v26, %v3204_v9  ;;  %v2206_v9 = vunpack.i.h.bf16 %v4344_v2  ;;  %v4353_v2 = vld [vmem:[#allocation14_spill] sm:$0xff] }
 0x175   : > { %v3485_v50 = vpop.permute.xlu1 %1090  ;;  %v1394_v48 = vsel %vm1377_vm4, %v1361_v5, %v3092_v18  ;;  %v1444_v44 = vsel %vm1443_vm7, %v1411_v45, %v3391_v29  ;;  %v2201_v18 = vunpack.i.h.bf16 %v4342_v58 }
 0x176   : > { %v1153_v6 = vpop.permute.xlu0 %1152  ;;  %v1427_v30 = vsel %vm1410_vm6, %v1394_v48, %v3303_v24  ;;  %v1477_v25 = vsel %vm1476_vm8, %v1444_v44, %v961_v27  ;;  %v4350_v48 = vld [vmem:[#allocation2_spill] sm:$0xff]  ;;  %v4351_v27 = vld [vmem:[#allocation45_spill] sm:$0xff] }
 0x177   : > { %1166 = vrot.lane.b32.xlu1 %v4284_v33, %s2237_s26  ;;  %v4349_v33 = vld [vmem:[#allocation60_spill] sm:$0xff]  ;;  %v1460_v0 = vsel %vm1443_vm7, %v1427_v30, %v892_v39  ;;  %v1510_v45 = vsel %vm1509_vm9, %v1477_v25, %v1057_v57  ;;  %v4354_v30 = vld [vmem:[#allocation61_spill] sm:$0xff] }
 0x178   : > { %1198 = vrot.lane.b32.xlu0 %v4343_v12, %s2237_s26  ;;  %v1493_v47 = vsel %vm1476_vm8, %v1460_v0, %v993_v60  ;;  %v1543_v39 = vsel %vm1542_vm10, %v1510_v45, %v1153_v6 }
 0x179   : > { %v1185_v62 = vpop.permute.xlu1 %1184  ;;  %v1526_v24 = vsel %vm1509_vm9, %v1493_v47, %v1089_v7 }
 0x17a   : > { %v3493_v1 = vpop.permute.xlu0 %895  ;;  %v1559_v58 = vsel %vm1542_vm10, %v1526_v24, %v1185_v62 }
 0x17b   : > { %1260 = vrot.lane.b32.xlu1 %v4348_v16, %s2238_s6 }
 0x17c   : > { %1292 = vrot.lane.b32.xlu0 %v4349_v33, %s2238_s6 }
 0x17d   : > { %v1155_v4 = vpop.permute.xlu1 %1154 }
 0x17e   : > { %v1187_v14 = vpop.permute.xlu0 %1186 }
 0x17f   : > { %909 = vrot.lane.b32.xlu1 %v4343_v12, %s2234_s21  ;;  %v4352_v12 = vld [vmem:[#allocation70_spill] sm:$0xff] }
 0x180   : > { %976 = vrot.lane.b32.xlu0 %v4348_v16, %s2235_s22  ;;  %v1346_v16 = vsel %vm1344_vm3, %v4350_v48, %v2201_v18  ;;  %v1362_v5 = vsel %vm1344_vm3, %v4353_v2, %v4352_v12  ;;  %v4363_v12 = vld [vmem:[#allocation46_spill] sm:$0xff] }
 0x181   : > { %v1249_v44 = vpop.permute.xlu1 %1248  ;;  %v1379_v60 = vsel %vm1377_vm4, %v1346_v16, %v2206_v9  ;;  %v4360_v16 = vld [vmem:[#allocation6_spill] sm:$0xff] }
 0x182   : > { %v1281_v26 = vpop.permute.xlu0 %1280  ;;  %v1576_v0 = vsel %vm1575_vm11, %v1543_v39, %v1249_v44  ;;  %v1412_v62 = vsel %vm1410_vm6, %v1379_v60, %v3219_v49  ;;  %v1395_v49 = vsel %vm1377_vm4, %v1362_v5, %v3101_v40  ;;  %v4357_v44 = vld [vmem:[#allocation13_spill] sm:$0xff]  ;;  %v4361_v60 = vld [vmem:[#allocation71_spill] sm:$0xff]  ;;  %v4364_v5 = vld [vmem:[#allocation62_spill] sm:$0xff] }
 0x183   : > { %v1592_v29 = vsel %vm1575_vm11, %v1559_v58, %v1281_v26  ;;  %1008 = vrot.lane.b32.xlu1 %v4349_v33, %s2235_s22  ;;  %2124 = vmatprep.mubr.msk.f32.mxu0 %vm1619_vm12, %v1576_v0  ;;  %v1445_v6 = vsel %vm1443_vm7, %v1412_v62, %v3401_v11  ;;  %v1428_v11 = vsel %vm1410_vm6, %v1395_v49, %v3313_v34  ;;  %v4356_v58 = vld [vmem:[#allocation34_spill] sm:$0xff]  ;;  %v4358_v26 = vld [vmem:[#allocation35_spill] sm:$0xff] }
 0x184   : > { %1262 = vrot.lane.b32.xlu0 %v4351_v27, %s2238_s6  ;;  %2148 = vmatprep.mubr.msk.f32.mxu1 %vm1619_vm12, %v1592_v29  ;;  %v1478_v33 = vsel %vm1476_vm8, %v1445_v6, %v3469_v35  ;;  %v1461_v35 = vsel %vm1443_vm7, %v1428_v11, %v3463_v21  ;;  %v4359_v29 = vld [vmem:[#allocation67_spill] sm:$0xff]  ;;  %v4362_v62 = vld [vmem:[#allocation18_spill] sm:$0xff] }
 0x185   : > { %v3539_v57 = vpop.permute.xlu1 %897  ;;  %v1511_v18 = vsel %vm1509_vm9, %v1478_v33, %v1059_v59  ;;  %v1494_v24 = vsel %vm1476_vm8, %v1461_v35, %v3475_v28  ;;  %v1363_v6 = vsel %vm1344_vm3, %v4362_v62, %v4361_v60  ;;  %v4365_v33 = vld [vmem:[#allocation77_spill] sm:$0xff]  ;;  %v4366_v49 = vld [vmem:[#allocation7_spill] sm:$0xff] }
 0x186   : > { %v965_v7 = vpop.permute.xlu0 %964  ;;  %v1544_v25 = vsel %vm1542_vm10, %v1511_v18, %v1155_v4  ;;  %v1527_v40 = vsel %vm1509_vm9, %v1494_v24, %v3485_v50  ;;  %v4355_v50 = vld [vmem:[#allocation12_spill] sm:$0xff]  ;;  %v1396_v18 = vsel %vm1377_vm4, %v1363_v6, %v4366_v49  ;;  %v4372_v60 = vld [vmem:[#allocation17_spill] sm:$0xff] }
 0x187   : > { %1294 = vrot.lane.b32.xlu1 %v4354_v30, %s2238_s6  ;;  %v1560_v34 = vsel %vm1542_vm10, %v1527_v40, %v1187_v14 }
 0x188   : > { %978 = vrot.lane.b32.xlu0 %v4351_v27, %s2235_s22  ;;  %v1347_v27 = vsel %vm1344_vm3, %v4360_v16, %v4359_v29 }
 0x189   : > { %v997_v47 = vpop.permute.xlu1 %996 }
 0x18a   : > { %v1251_v9 = vpop.permute.xlu0 %1250 }
 0x18b   : > { %v1577_v45 = vsel %vm1575_vm11, %v1544_v25, %v1251_v9  ;;  %1010 = vrot.lane.b32.xlu1 %v4354_v30, %s2235_s22  ;;  %v1380_v30 = vsel %vm1377_vm4, %v1347_v27, %v4365_v33  ;;  %v1429_v25 = vsel %vm1410_vm6, %v1396_v18, %v3315_v36  ;;  %v4371_v27 = vld [vmem:[#allocation72_spill] sm:$0xff] }
 0x18c   : > { %1072 = vrot.lane.b32.xlu0 %v2400_v10, %s2236_s23  ;;  %2125 = vmatmul.mubr.msk.f32.vlgmr.msra.gmra.mxu0 %vm1619_vm12, %v1577_v45  ;;  %v1413_v11 = vsel %vm1410_vm6, %v1380_v30, %v3221_v61  ;;  %v1462_v24 = vsel %vm1443_vm7, %v1429_v25, %v3493_v1  ;;  %v1364_v6 = vsel %vm1344_vm3, %v4372_v60, %v4371_v27  ;;  %v4374_v33 = vld [vmem:[#allocation8_spill] sm:$0xff] }
 0x18d   : > { %v1283_v59 = vpop.permute.xlu1 %1282  ;;  %v1446_v45 = vsel %vm1443_vm7, %v1413_v11, %v3403_v53 }
 0x18e   : > { %v967_v21 = vpop.permute.xlu0 %966  ;;  %v1593_v4 = vsel %vm1575_vm11, %v1560_v34, %v1283_v59  ;;  %v1479_v40 = vsel %vm1476_vm8, %v1446_v45, %v965_v7  ;;  %v1495_v34 = vsel %vm1476_vm8, %v1462_v24, %v997_v47  ;;  %v4375_v24 = vld [vmem:[#allocation10_spill] sm:$0xff] }
 0x18f   : > { %1104 = vrot.lane.b32.xlu1 %v2609_v20, %s2236_s23  ;;  %2149 = vmatmul.mubr.msk.f32.vlgmr.msra.gmra.mxu1 %vm1619_vm12, %v1593_v4 }
 0x190   : > { %1074 = vrot.lane.b32.xlu0 %v2410_v17, %s2236_s23 }
 0x191   : > { %v999_v10 = vpop.permute.xlu1 %998 }
 0x192   : > { %v1061_v28 = vpop.permute.xlu0 %1060 }
 0x193   : > { %1106 = vrot.lane.b32.xlu1 %v2606_v22, %s2236_s23  ;;  %v1512_v61 = vsel %vm1509_vm9, %v1479_v40, %v1061_v28  ;;  %v4369_v28 = vld [vmem:[#allocation47_spill] sm:$0xff] }
 0x194   : > { %1168 = vrot.lane.b32.xlu0 %v4355_v50, %s2237_s26  ;;  %v4367_v50 = vld [vmem:[#allocation66_spill] sm:$0xff] }
 0x195   : > { %v1093_v14 = vpop.permute.xlu1 %1092 }
 0x196   : > { %v1063_v39 = vpop.permute.xlu0 %1062  ;;  %v1528_v36 = vsel %vm1509_vm9, %v1495_v34, %v1093_v14  ;;  %v4370_v14 = vld [vmem:[#allocation80_spill] sm:$0xff] }
 0x197   : > { %1200 = vrot.lane.b32.xlu1 %v4356_v58, %s2237_s26 }
 0x198   : > { %911 = vrot.lane.b32.xlu0 %v4356_v58, %s2234_s21  ;;  %v4368_v58 = vld [vmem:[#allocation5_spill] sm:$0xff] }
 0x199   : > { %v1095_v20 = vpop.permute.xlu1 %1094 }
 0x19a   : > { %v1157_v17 = vpop.permute.xlu0 %1156 }
 0x19b   : > { %1170 = vrot.lane.b32.xlu1 %v4357_v44, %s2237_s26  ;;  %v1545_v59 = vsel %vm1542_vm10, %v1512_v61, %v1157_v17  ;;  %v1348_v44 = vsel %vm1344_vm3, %v4368_v58, %v4367_v50  ;;  %v4382_v50 = vld [vmem:[#allocation65_spill] sm:$0xff] }
 0x19c   : > { %1202 = vrot.lane.b32.xlu0 %v4358_v26, %s2237_s26  ;;  %v1381_v17 = vsel %vm1377_vm4, %v1348_v44, %v4370_v14 }
 0x19d   : > { %v1189_v22 = vpop.permute.xlu1 %1188 }
 0x19e   : > { %v3589_v0 = vpop.permute.xlu0 %899  ;;  %v1561_v53 = vsel %vm1542_vm10, %v1528_v36, %v1189_v22 }
 0x19f   : > { %1264 = vrot.lane.b32.xlu1 %v4363_v12, %s2238_s6  ;;  %v1464_v14 = vsel %vm1443_vm7, %v3325_v23, %v3589_v0 }
 0x1a0   : > { %1296 = vrot.lane.b32.xlu0 %v4364_v5, %s2238_s6 }
 0x1a1   : > { %v1159_v9 = vpop.permute.xlu1 %1158 }
 0x1a2   : > { %v1191_v35 = vpop.permute.xlu0 %1190 }
 0x1a3   : > { %913 = vrot.lane.b32.xlu1 %v4358_v26, %s2234_s21  ;;  %v1414_v26 = vsel %vm1410_vm6, %v1381_v17, %v3233_v3  ;;  %v1397_v3 = vsel %vm1377_vm4, %v1364_v6, %v4374_v33 }
 0x1a4   : > { %980 = vrot.lane.b32.xlu0 %v4363_v12, %s2235_s22  ;;  %v1447_v16 = vsel %vm1443_vm7, %v1414_v26, %v3409_v15  ;;  %v1430_v15 = vsel %vm1410_vm6, %v1397_v3, %v3321_v41  ;;  %v1449_v3 = vsel %vm1443_vm7, %v3245_v31, %v3417_v52 }
 0x1a5   : > { %v1253_v4 = vpop.permute.xlu1 %1252  ;;  %v1480_v12 = vsel %vm1476_vm8, %v1447_v16, %v967_v21  ;;  %v1463_v21 = vsel %vm1443_vm7, %v1430_v15, %v3539_v57  ;;  %v4384_v15 = vld [vmem:[#allocation68_spill] sm:$0xff] }
 0x1a6   : > { %v1285_v1 = vpop.permute.xlu0 %1284  ;;  %v1578_v7 = vsel %vm1575_vm11, %v1545_v59, %v1253_v4  ;;  %v1513_v30 = vsel %vm1509_vm9, %v1480_v12, %v1063_v39  ;;  %v1496_v45 = vsel %vm1476_vm8, %v1463_v21, %v999_v10  ;;  %v4376_v10 = vld [vmem:[#allocation9_spill] sm:$0xff]  ;;  %v4378_v59 = vld [vmem:[#allocation36_spill] sm:$0xff]  ;;  %v4379_v4 = vld [vmem:[#allocation19_spill] sm:$0xff] }
 0x1a7   : > { %v1594_v47 = vsel %vm1575_vm11, %v1561_v53, %v1285_v1  ;;  %1012 = vrot.lane.b32.xlu1 %v4364_v5, %s2235_s22  ;;  %2127 = vmatprep.mubr.msk.f32.mxu0 %vm1619_vm12, %v1578_v7  ;;  %v4373_v5 = vld [vmem:[#allocation64_spill] sm:$0xff]  ;;  %v1546_v49 = vsel %vm1542_vm10, %v1513_v30, %v1159_v9  ;;  %v1529_v39 = vsel %vm1509_vm9, %v1496_v45, %v1095_v20  ;;  %v4380_v1 = vld [vmem:[#allocation37_spill] sm:$0xff] }
 0x1a8   : > { %1266 = vrot.lane.b32.xlu0 %v4369_v28, %s2238_s6  ;;  %2151 = vmatprep.mubr.msk.f32.mxu1 %vm1619_vm12, %v1594_v47  ;;  %v1562_v41 = vsel %vm1542_vm10, %v1529_v39, %v1191_v35  ;;  %v4377_v20 = vld [vmem:[#allocation16_spill] sm:$0xff]  ;;  %v4383_v12 = vld [vmem:[#allocation49_spill] sm:$0xff] }
 0x1a9   : > { %v3638_v22 = vpop.permute.xlu1 %901  ;;  %v4381_v47 = vld [vmem:[#allocation48_spill] sm:$0xff] }
 0x1aa   : > { %v969_v29 = vpop.permute.xlu0 %968 }
 0x1ab   : > { %1298 = vrot.lane.b32.xlu1 %v4373_v5, %s2238_s6 }
 0x1ac   : > { %982 = vrot.lane.b32.xlu0 %v4369_v28, %s2235_s22  ;;  %v1448_v28 = vsel %vm1443_vm7, %v3237_v55, %v3411_v43 }
 0x1ad   : > { %v1001_v18 = vpop.permute.xlu1 %1000  ;;  %v1481_v17 = vsel %vm1476_vm8, %v1448_v28, %v969_v29 }
 0x1ae   : > { %v1255_v11 = vpop.permute.xlu0 %1254  ;;  %v1497_v26 = vsel %vm1476_vm8, %v1464_v14, %v1001_v18  ;;  %v4391_v14 = vld [vmem:[#allocation50_spill] sm:$0xff] }
 0x1af   : > { %v1579_v25 = vsel %vm1575_vm11, %v1546_v49, %v1255_v11  ;;  %1014 = vrot.lane.b32.xlu1 %v4373_v5, %s2235_s22 }
 0x1b0   : > { %1076 = vrot.lane.b32.xlu0 %v4375_v24, %s2236_s23  ;;  %2128 = vmatmul.mubr.msk.f32.gmra.mxu0 %vm1619_vm12, %v1579_v25  ;;  %v1465_v25 = vsel %vm1443_vm7, %v3333_v38, %v3638_v22  ;;  %v4385_v22 = vld [vmem:[#allocation79_spill] sm:$0xff] }
 0x1b1   : > { %v1287_v9 = vpop.permute.xlu1 %1286 }
 0x1b2   : > { %v971_v40 = vpop.permute.xlu0 %970  ;;  %v1595_v57 = vsel %vm1575_vm11, %v1562_v41, %v1287_v9  ;;  %v854_v9 = vrot.slane %v4385_v22, 1 }
 0x1b3   : > { %1108 = vrot.lane.b32.xlu1 %v4297_v42, %s2236_s23  ;;  %2152 = vmatmul.mubr.msk.f32.gmra.mxu1 %vm1619_vm12, %v1595_v57  ;;  %v1482_v30 = vsel %vm1476_vm8, %v1449_v3, %v971_v40  ;;  %v4386_v40 = vld [vmem:[#allocation82_spill] sm:$0xff] }
 0x1b4   : > { %1078 = vrot.lane.b32.xlu0 %v4376_v10, %s2236_s23 }
 0x1b5   : > { %v1003_v34 = vpop.permute.xlu1 %1002 }
 0x1b6   : > { %v1065_v61 = vpop.permute.xlu0 %1064  ;;  %v1498_v52 = vsel %vm1476_vm8, %v1465_v25, %v1003_v34  ;;  %v4387_v34 = vld [vmem:[#allocation78_spill] sm:$0xff] }
 0x1b7   : > { %1110 = vrot.lane.b32.xlu1 %v2631_v63, %s2236_s23  ;;  %v1514_v16 = vsel %vm1509_vm9, %v1481_v17, %v1065_v61  ;;  %v4388_v61 = vrot.slane %v4387_v34, 7  ;;  %v4398_v34 = vld [vmem:[#allocation53_spill] sm:$0xff] }
 0x1b8   : > { %1172 = vrot.lane.b32.xlu0 %v4377_v20, %s2237_s26 }
 0x1b9   : > { %v1097_v35 = vpop.permute.xlu1 %1096  ;;  %v369_v20 = vsel %vm236_vm0, %v4388_v61, 0.0 }
 0x1ba   : > { %v1067_v36 = vpop.permute.xlu0 %1066  ;;  %v1530_v27 = vsel %vm1509_vm9, %v1497_v26, %v1097_v35  ;;  %v4389_v35 = vld [vmem:[#allocation20_spill] sm:$0xff] }
 0x1bb   : > { %1204 = vrot.lane.b32.xlu1 %v4378_v59, %s2237_s26  ;;  %v1515_v49 = vsel %vm1509_vm9, %v1482_v30, %v1067_v36  ;;  %v857_v36 = vrot.slane %v369_v20, 1 }
 0x1bc   : > { %915 = vrot.lane.b32.xlu0 %v4378_v59, %s2234_s21 }
 0x1bd   : > { %v1099_v42 = vpop.permute.xlu1 %1098 }
 0x1be   : > { %v1161_v53 = vpop.permute.xlu0 %1160  ;;  %v1531_v45 = vsel %vm1509_vm9, %v1498_v52, %v1099_v42 }
 0x1bf   : > { %1174 = vrot.lane.b32.xlu1 %v4379_v4, %s2237_s26  ;;  %v1547_v55 = vsel %vm1542_vm10, %v1514_v16, %v1161_v53  ;;  %v955_v53 = vrot.slane %v4385_v22, 2  ;;  %v956_v4 = vrot.slane %v4386_v40, 2  ;;  %v1450_v16 = vsel %vm1443_vm7, %v3249_v54, %v3419_v13 }
 0x1c0   : > { %1206 = vrot.lane.b32.xlu0 %v4380_v1, %s2237_s26 }
 0x1c1   : > { %v1193_v63 = vpop.permute.xlu1 %1192 }
 0x1c2   : > { %v3685_v7 = vpop.permute.xlu0 %903  ;;  %v1563_v43 = vsel %vm1542_vm10, %v1530_v27, %v1193_v63 }
 0x1c3   : > { %1268 = vrot.lane.b32.xlu1 %v4381_v47, %s2238_s6  ;;  %v1466_v27 = vsel %vm1443_vm7, %v3337_v56, %v3685_v7 }
 0x1c4   : > { %1300 = vrot.lane.b32.xlu0 %v4382_v50, %s2238_s6 }
 0x1c5   : > { %v1163_v58 = vpop.permute.xlu1 %1162 }
 0x1c6   : > { %v1195_v44 = vpop.permute.xlu0 %1194  ;;  %v1548_v18 = vsel %vm1542_vm10, %v1515_v49, %v1163_v58  ;;  %v957_v58 = vsel %vm579_vm2, %v955_v53, %v956_v4  ;;  %v1451_v49 = vsel %vm1443_vm7, %v3257_v19, %v3425_v51  ;;  %v2207_v51 = vpack.i.bf16 %v4350_v48, %v4347_v37  ;;  %v4393_v37 = vld [vmem:[#allocation22_spill] sm:$0xff]  ;;  %v4394_v48 = vld [vmem:[#allocation4_spill] sm:$0xff] }
 0x1c7   : > { %917 = vrot.lane.b32.xlu1 %v4380_v1, %s2234_s21  ;;  %v1564_v24 = vsel %vm1542_vm10, %v1531_v45, %v1195_v44 }
 0x1c8   : > { %984 = vrot.lane.b32.xlu0 %v4381_v47, %s2235_s22 }
 0x1c9   : > { %v1257_v6 = vpop.permute.xlu1 %1256 }
 0x1ca   : > { %v1289_v23 = vpop.permute.xlu0 %1288  ;;  %v1580_v0 = vsel %vm1575_vm11, %v1547_v55, %v1257_v6 }
 0x1cb   : > { %v1596_v29 = vsel %vm1575_vm11, %v1563_v43, %v1289_v23  ;;  %1016 = vrot.lane.b32.xlu1 %v4382_v50, %s2235_s22  ;;  %2130 = vmatprep.mubr.msk.f32.mxu0 %vm1619_vm12, %v1580_v0  ;;  %v4390_v50 = vld [vmem:[#allocation21_spill] sm:$0xff]  ;;  %v958_v0 = vrot.slane %v369_v20, 2 }
 0x1cc   : > { %1270 = vrot.lane.b32.xlu0 %v4383_v12, %s2238_s6  ;;  %2154 = vmatprep.mubr.msk.f32.mxu1 %vm1619_vm12, %v1596_v29 }
 0x1cd   : > { %v3715_v5 = vpop.permute.xlu1 %905  ;;  %v959_v3 = vsel %vm579_vm2, %v956_v4, %v958_v0 }
 0x1ce   : > { %v973_v33 = vpop.permute.xlu0 %972  ;;  %v1467_v52 = vsel %vm1443_vm7, %v3345_v46, %v3715_v5 }
 0x1cf   : > { %1302 = vrot.lane.b32.xlu1 %v4384_v15, %s2238_s6  ;;  %v1483_v55 = vsel %vm1476_vm8, %v1450_v16, %v973_v33  ;;  %v4392_v33 = vld [vmem:[#allocation51_spill] sm:$0xff]  ;;  %v4401_v16 = vld [vmem:[#allocation41_spill] sm:$0xff] }
 0x1d0   : > { %986 = vrot.lane.b32.xlu0 %v4383_v12, %s2235_s22 }
 0x1d1   : > { %v1005_v11 = vpop.permute.xlu1 %1004 }
 0x1d2   : > { %v1259_v21 = vpop.permute.xlu0 %1258  ;;  %v1499_v43 = vsel %vm1476_vm8, %v1466_v27, %v1005_v11  ;;  %v4402_v27 = vld [vmem:[#allocation73_spill] sm:$0xff] }
 0x1d3   : > { %v1581_v31 = vsel %vm1575_vm11, %v1548_v18, %v1259_v21  ;;  %1018 = vrot.lane.b32.xlu1 %v4384_v15, %s2235_s22 }
 0x1d4   : > { %1080 = vrot.lane.b32.xlu0 %v4346_v32, %s2236_s23  ;;  %2131 = vmatmul.mubr.msk.f32.gmra.mxu0 %vm1619_vm12, %v1581_v31  ;;  %v855_v32 = vrot.slane %v4386_v40, 1 }
 0x1d5   : > { %v1291_v39 = vpop.permute.xlu1 %1290 }
 0x1d6   : > { %v975_v41 = vpop.permute.xlu0 %974  ;;  %v1597_v38 = vsel %vm1575_vm11, %v1564_v24, %v1291_v39  ;;  %v858_v1 = vsel %vm402_vm1, %v855_v32, %v857_v36  ;;  %v4399_v36 = vld [vmem:[#allocation11_spill] sm:$0xff] }
 0x1d7   : > { %1112 = vrot.lane.b32.xlu1 %v4385_v22, %s2236_s23  ;;  %2155 = vmatmul.mubr.msk.f32.gmra.mxu1 %vm1619_vm12, %v1597_v38  ;;  %v1484_v18 = vsel %vm1476_vm8, %v1451_v49, %v975_v41 }
 0x1d8   : > { %1082 = vrot.lane.b32.xlu0 %v4353_v2, %s2236_s23  ;;  %v856_v2 = vsel %vm402_vm1, %v854_v9, %v855_v32  ;;  %v4396_v32 = vld [vmem:[#allocation52_spill] sm:$0xff] }
 0x1d9   : > { %v1007_v57 = vpop.permute.xlu1 %1006 }
 0x1da   : > { %v1069_v10 = vpop.permute.xlu0 %1068  ;;  %v1500_v19 = vsel %vm1476_vm8, %v1467_v52, %v1007_v57 }
 0x1db   : > { %1114 = vrot.lane.b32.xlu1 %v4386_v40, %s2236_s23  ;;  %v1516_v6 = vsel %vm1509_vm9, %v1483_v55, %v1069_v10  ;;  %v4395_v40 = vld [vmem:[#allocation23_spill] sm:$0xff]  ;;  %v4397_v10 = vld [vmem:[#allocation24_spill] sm:$0xff]  ;;  %v1453_v55 = vsel %vm1443_vm7, %v4402_v27, %v4401_v16  ;;  %v3900_v27 = vld [vmem:[%s4071_s2] ss:$0 sm:$0xff] }
 0x1dc   : > { %1176 = vrot.lane.b32.xlu0 %v4389_v35, %s2237_s26 }
 0x1dd   : > { %v1101_v59 = vpop.permute.xlu1 %1100 }
 0x1de   : > { %v1071_v42 = vpop.permute.xlu0 %1070  ;;  %v1532_v23 = vsel %vm1509_vm9, %v1499_v43, %v1101_v59  ;;  %v1452_v59 = vsel %vm1443_vm7, %v4399_v36, %v3427_v8 }
 0x1df   : > { %1208 = vrot.lane.b32.xlu1 %v856_v2, %s2237_s26  ;;  %v1517_v11 = vsel %vm1509_vm9, %v1484_v18, %v1071_v42  ;;  %v4400_v42 = vld [vmem:[#allocation38_spill] sm:$0xff] }
 0x1e0   : > { %919 = vrot.lane.b32.xlu0 %v856_v2, %s2234_s21 }
 0x1e1   : > { %v1103_v63 = vpop.permute.xlu1 %1102 }
 0x1e2   : > { %v1165_v47 = vpop.permute.xlu0 %1164  ;;  %v1533_v24 = vsel %vm1509_vm9, %v1500_v19, %v1103_v63 }
 0x1e3   : > { %1178 = vrot.lane.b32.xlu1 %v4390_v50, %s2237_s26  ;;  %v1549_v54 = vsel %vm1542_vm10, %v1516_v6, %v1165_v47 }
 0x1e4   : > { %1210 = vrot.lane.b32.xlu0 %v858_v1, %s2237_s26 }
 0x1e5   : > { %v1197_v44 = vpop.permute.xlu1 %1196 }
 0x1e6   : > { %v3764_v28 = vpop.permute.xlu0 %907  ;;  %v1565_v13 = vsel %vm1542_vm10, %v1532_v23, %v1197_v44 }
 0x1e7   : > { %1272 = vrot.lane.b32.xlu1 %v4391_v14, %s2238_s6  ;;  %v1468_v53 = vsel %vm1443_vm7, %v4400_v42, %v3764_v28 }
 0x1e8   : > { %1304 = vrot.lane.b32.xlu0 %v957_v58, %s2238_s6 }
 0x1e9   : > { %v1167_v17 = vpop.permute.xlu1 %1166 }
 0x1ea   : > { %v1199_v26 = vpop.permute.xlu0 %1198  ;;  %v1550_v21 = vsel %vm1542_vm10, %v1517_v11, %v1167_v17 }
 0x1eb   : > { %921 = vrot.lane.b32.xlu1 %v858_v1, %s2234_s21  ;;  %v1566_v39 = vsel %vm1542_vm10, %v1533_v24, %v1199_v26  ;;  %v4404_v24 = vld [vmem:[#allocation57_spill] sm:$0xff] }
 0x1ec   : > { %988 = vrot.lane.b32.xlu0 %v4391_v14, %s2235_s22 }
 0x1ed   : > { %v1261_v29 = vpop.permute.xlu1 %1260 }
 0x1ee   : > { %v1293_v56 = vpop.permute.xlu0 %1292  ;;  %v1582_v7 = vsel %vm1575_vm11, %v1549_v54, %v1261_v29 }
 0x1ef   : > { %v1598_v12 = vsel %vm1575_vm11, %v1565_v13, %v1293_v56  ;;  %1020 = vrot.lane.b32.xlu1 %v957_v58, %s2235_s22  ;;  %2133 = vmatprep.mubr.msk.f32.mxu0 %vm1619_vm12, %v1582_v7  ;;  %v4403_v13 = vld [vmem:[#allocation54_spill] sm:$0xff] }
 0x1f0   : > { %1274 = vrot.lane.b32.xlu0 %v4392_v33, %s2238_s6  ;;  %2157 = vmatprep.mubr.msk.f32.mxu1 %vm1619_vm12, %v1598_v12 }
 0x1f1   : > { %v3792_v30 = vpop.permute.xlu1 %909 }
 0x1f2   : > { %v977_v15 = vpop.permute.xlu0 %976  ;;  %v1469_v29 = vsel %vm1443_vm7, %v4403_v13, %v3792_v30 }
 0x1f3   : > { %1306 = vrot.lane.b32.xlu1 %v959_v3, %s2238_s6  ;;  %v1485_v4 = vsel %vm1476_vm8, %v1452_v59, %v977_v15 }
 0x1f4   : > { %990 = vrot.lane.b32.xlu0 %v4392_v33, %s2235_s22 }
 0x1f5   : > { %v1009_v25 = vpop.permute.xlu1 %1008 }
 0x1f6   : > { %v1263_v31 = vpop.permute.xlu0 %1262  ;;  %v1501_v1 = vsel %vm1476_vm8, %v1468_v53, %v1009_v25 }
 0x1f7   : > { %v1583_v45 = vsel %vm1575_vm11, %v1550_v21, %v1263_v31  ;;  %1022 = vrot.lane.b32.xlu1 %v959_v3, %s2235_s22 }
 0x1f8   : > { %1084 = vrot.lane.b32.xlu0 %v4362_v62, %s2236_s23  ;;  %2134 = vmatmul.mubr.msk.f32.gmra.mxu0 %vm1619_vm12, %v1583_v45 }
 0x1f9   : > { %v1295_v41 = vpop.permute.xlu1 %1294 }
 0x1fa   : > { %v979_v46 = vpop.permute.xlu0 %978  ;;  %v1599_v5 = vsel %vm1575_vm11, %v1566_v39, %v1295_v41  ;;  %v4405_v39 = vld [vmem:[#allocation74_spill] sm:$0xff] }
 0x1fb   : > { %2208 = vrot.lane.b32.xlu1 %v2207_v51, %s2236_s23  ;;  %2158 = vmatmul.mubr.msk.f32.gmra.mxu1 %vm1619_vm12, %v1599_v5  ;;  %v1486_v43 = vsel %vm1476_vm8, %v1453_v55, %v979_v46  ;;  %v1454_v41 = vsel %vm1443_vm7, %v4405_v39, %v4404_v24  ;;  %v4406_v46 = vld [vmem:[#allocation39_spill] sm:$0xff] }
 0x1fc   : > { %1086 = vrot.lane.b32.xlu0 %v4372_v60, %s2236_s23 }
 0x1fd   : > { %v1011_v62 = vpop.permute.xlu1 %1010 }
 0x1fe   : > { %v1073_v38 = vpop.permute.xlu0 %1072  ;;  %v1502_v7 = vsel %vm1476_vm8, %v1469_v29, %v1011_v62 }
 0x1ff   : > { %1180 = vrot.lane.b32.xlu1 %v4393_v37, %s2237_s26  ;;  %v1518_v63 = vsel %vm1509_vm9, %v1485_v4, %v1073_v38  ;;  %v4409_v4 = vld [vmem:[#allocation55_spill] sm:$0xff] }
 0x200   : > { %2213 = vrot.lane.b32.xlu0 %v4394_v48, %s2237_s26 }
 0x201   : > { %v1105_v22 = vpop.permute.xlu1 %1104 }
 0x202   : > { %v1075_v9 = vpop.permute.xlu0 %1074  ;;  %v1534_v47 = vsel %vm1509_vm9, %v1501_v1, %v1105_v22 }
 0x203   : > { %1182 = vrot.lane.b32.xlu1 %v4395_v40, %s2237_s26  ;;  %v1519_v6 = vsel %vm1509_vm9, %v1486_v43, %v1075_v9 }
 0x204   : > { %1276 = vrot.lane.b32.xlu0 %v4396_v32, %s2238_s6 }
 0x205   : > { %v1107_v57 = vpop.permute.xlu1 %1106 }
 0x206   : > { %v1169_v60 = vpop.permute.xlu0 %1168  ;;  %v1535_v12 = vsel %vm1509_vm9, %v1502_v7, %v1107_v57 }
 0x207   : > { %2218 = vrot.lane.b32.xlu1 %v4397_v10, %s2238_s6  ;;  %v1551_v50 = vsel %vm1542_vm10, %v1518_v63, %v1169_v60 }
 0x208   : > { %1278 = vrot.lane.b32.xlu0 %v4398_v34, %s2238_s6 }
 0x209   : > { %v1201_v61 = vpop.permute.xlu1 %1200 }
 0x20a   : > { %v912_v20 = vpop.permute.xlu0 %911  ;;  %v1567_v58 = vsel %vm1542_vm10, %v1534_v47, %v1201_v61  ;;  %v4407_v61 = vld [vmem:[#allocation29_spill] sm:$0xff] }
 0x20b   : > { %v1470_v5 = vsel %vm1443_vm7, %v4406_v46, %v912_v20  ;;  %v4408_v20 = vld [vmem:[#allocation33_spill] sm:$0xff] }
 0x20d   : > { %v1171_v35 = vpop.permute.xlu1 %1170 }
 0x20e   : > { %v1203_v2 = vpop.permute.xlu0 %1202  ;;  %v1552_v23 = vsel %vm1542_vm10, %v1519_v6, %v1171_v35  ;;  %v1455_v35 = vsel %vm1443_vm7, %v4408_v20, %v4407_v61 }
 0x20f   : > { %v1568_v33 = vsel %vm1542_vm10, %v1535_v12, %v1203_v2 }
 0x211   : > { %v1265_v44 = vpop.permute.xlu1 %1264 }
 0x212   : > { %v1297_v14 = vpop.permute.xlu0 %1296  ;;  %v1584_v8 = vsel %vm1575_vm11, %v1551_v50, %v1265_v44 }
 0x213   : > { %v1600_v17 = vsel %vm1575_vm11, %v1567_v58, %v1297_v14  ;;  %2136 = vmatprep.mubr.msk.f32.mxu0 %vm1619_vm12, %v1584_v8 }
 0x214   : > { %2160 = vmatprep.mubr.msk.f32.mxu1 %vm1619_vm12, %v1600_v17 }
 0x215   : > { %v914_v28 = vpop.permute.xlu1 %913 }
 0x216   : > { %v981_v26 = vpop.permute.xlu0 %980  ;;  %v1471_v1 = vsel %vm1443_vm7, %v4409_v4, %v914_v28 }
 0x217   : > { %v1487_v62 = vsel %vm1476_vm8, %v1454_v41, %v981_v26 }
 0x219   : > { %v1013_v0 = vpop.permute.xlu1 %1012 }
 0x21a   : > { %v1267_v54 = vpop.permute.xlu0 %1266  ;;  %v1503_v38 = vsel %vm1476_vm8, %v1470_v5, %v1013_v0 }
 0x21b   : > { %v1585_v56 = vsel %vm1575_vm11, %v1552_v23, %v1267_v54 }
 0x21c   : > { %2137 = vmatmul.mubr.msk.f32.gmra.mxu0 %vm1619_vm12, %v1585_v56 }
 0x21d   : > { %v1299_v3 = vpop.permute.xlu1 %1298 }
 0x21e   : > { %v983_v15 = vpop.permute.xlu0 %982  ;;  %v1601_v49 = vsel %vm1575_vm11, %v1568_v33, %v1299_v3 }
 0x21f   : > { %2161 = vmatmul.mubr.msk.f32.gmra.mxu1 %vm1619_vm12, %v1601_v49  ;;  %v1488_v2 = vsel %vm1476_vm8, %v1455_v35, %v983_v15  ;;  %v4410_v49 = vld [vmem:[#allocation30_spill] sm:$0xff] }
 0x221   : > { %v1015_v18 = vpop.permute.xlu1 %1014 }
 0x222   : > { %v1077_v11 = vpop.permute.xlu0 %1076  ;;  %v1504_v47 = vsel %vm1476_vm8, %v1471_v1, %v1015_v18  ;;  %v4411_v18 = vld [vmem:[#allocation75_spill] sm:$0xff] }
 0x223   : > { %v1520_v37 = vsel %vm1509_vm9, %v1487_v62, %v1077_v11  ;;  %v1456_v11 = vsel %vm1443_vm7, %v4411_v18, %v4410_v49 }
 0x225   : > { %v1109_v21 = vpop.permute.xlu1 %1108 }
 0x226   : > { %v1079_v30 = vpop.permute.xlu0 %1078  ;;  %v1536_v48 = vsel %vm1509_vm9, %v1503_v38, %v1109_v21  ;;  %v4412_v21 = vld [vmem:[#allocation27_spill] sm:$0xff]  ;;  %v4413_v38 = vld [vmem:[#allocation42_spill] sm:$0xff] }
 0x227   : > { %v1521_v36 = vsel %vm1509_vm9, %v1488_v2, %v1079_v30 }
 0x229   : > { %v1111_v25 = vpop.permute.xlu1 %1110 }
 0x22a   : > { %v1173_v31 = vpop.permute.xlu0 %1172  ;;  %v1537_v50 = vsel %vm1509_vm9, %v1504_v47, %v1111_v25 }
 0x22b   : > { %v1553_v22 = vsel %vm1542_vm10, %v1520_v37, %v1173_v31  ;;  %v4414_v37 = vld [vmem:[#allocation25_spill] sm:$0xff] }
 0x22d   : > { %v1205_v52 = vpop.permute.xlu1 %1204 }
 0x22e   : > { %v916_v45 = vpop.permute.xlu0 %915  ;;  %v1569_v9 = vsel %vm1542_vm10, %v1536_v48, %v1205_v52  ;;  %v1457_v48 = vsel %vm1443_vm7, %v4414_v37, %v4413_v38 }
 0x22f   : > { %v1472_v30 = vsel %vm1443_vm7, %v4412_v21, %v916_v45 }
 0x231   : > { %v1175_v19 = vpop.permute.xlu1 %1174 }
 0x232   : > { %v1207_v51 = vpop.permute.xlu0 %1206  ;;  %v1554_v59 = vsel %vm1542_vm10, %v1521_v36, %v1175_v19 }
 0x233   : > { %v1570_v58 = vsel %vm1542_vm10, %v1537_v50, %v1207_v51 }
 0x235   : > { %v1269_v40 = vpop.permute.xlu1 %1268 }
 0x236   : > { %v1301_v32 = vpop.permute.xlu0 %1300  ;;  %v1586_v57 = vsel %vm1575_vm11, %v1553_v22, %v1269_v40 }
 0x237   : > { %v1602_v60 = vsel %vm1575_vm11, %v1569_v9, %v1301_v32  ;;  %2139 = vmatprep.mubr.msk.f32.mxu0 %vm1619_vm12, %v1586_v57 }
 0x238   : > { %2163 = vmatprep.mubr.msk.f32.mxu1 %vm1619_vm12, %v1602_v60  ;;  %v4415_v60 = vld [vmem:[#allocation28_spill] sm:$0xff] }
 0x239   : > { %v3880_v10 = vpop.permute.xlu1 %917 }
 0x23a   : > { %v985_v34 = vpop.permute.xlu0 %984 }
 0x23b   : > { %v1489_v25 = vsel %vm1476_vm8, %v1456_v11, %v985_v34  ;;  %v1473_v34 = vsel %vm1443_vm7, %v4415_v60, %v3880_v10 }
 0x23d   : > { %v1017_v42 = vpop.permute.xlu1 %1016 }
 0x23e   : > { %v1271_v53 = vpop.permute.xlu0 %1270  ;;  %v1505_v31 = vsel %vm1476_vm8, %v1472_v30, %v1017_v42 }
 0x23f   : > { %v1587_v63 = vsel %vm1575_vm11, %v1554_v59, %v1271_v53 }
 0x240   : > { %2140 = vmatmul.mubr.msk.f32.gmra.mxu0 %vm1619_vm12, %v1587_v63 }
 0x241   : > { %v1303_v44 = vpop.permute.xlu1 %1302 }
 0x242   : > { %v987_v14 = vpop.permute.xlu0 %986  ;;  %v1603_v8 = vsel %vm1575_vm11, %v1570_v58, %v1303_v44  ;;  %v4416_v44 = vld [vmem:[#allocation58_spill] sm:$0xff] }
 0x243   : > { %2164 = vmatmul.mubr.msk.f32.gmra.mxu1 %vm1619_vm12, %v1603_v8  ;;  %v1490_v22 = vsel %vm1476_vm8, %v1457_v48, %v987_v14  ;;  %v4417_v14 = vld [vmem:[#allocation81_spill] sm:$0xff] }
 0x244   : > { %v1458_v8 = vsel %vm1443_vm7, %v4417_v14, %v4416_v44 }
 0x245   : > { %v1019_v17 = vpop.permute.xlu1 %1018 }
 0x246   : > { %v1081_v26 = vpop.permute.xlu0 %1080  ;;  %v1506_v20 = vsel %vm1476_vm8, %v1473_v34, %v1019_v17 }
 0x247   : > { %v1522_v52 = vsel %vm1509_vm9, %v1489_v25, %v1081_v26  ;;  %v4421_v25 = vld [vmem:[#allocation56_spill] sm:$0xff] }
 0x249   : > { %v1113_v16 = vpop.permute.xlu1 %1112 }
 0x24a   : > { %v1083_v28 = vpop.permute.xlu0 %1082  ;;  %v1538_v19 = vsel %vm1509_vm9, %v1505_v31, %v1113_v16 }
 0x24b   : > { %v1523_v9 = vsel %vm1509_vm9, %v1490_v22, %v1083_v28 }
 0x24c   : > { %v2126_v55 = vpop.f32.mrf.mxu0 }
 0x24d   : > { %v1792_v43 = vadd.f32 %v2126_v55, %v3900_v27  ;;  %v1115_v6 = vpop.permute.xlu1 %1114 }
 0x24e   : > { %v1177_v23 = vpop.permute.xlu0 %1176  ;;  %v1786_v0 = vpop.f32.mrf.mxu0  ;;  %v1539_v35 = vsel %vm1509_vm9, %v1506_v20, %v1115_v6 }
 0x24f   : > { %1947 = vst.msk [vmem:[%s3907_s11 + $0x8] sm:$0xff] %vm1945_vm13, %v1792_v43  ;;  %v1787_v54 = vadd.f32 %v3900_v27, %v1786_v0  ;;  %v2150_v13 = vpop.f32.mrf.mxu1  ;;  %v1555_v51 = vsel %vm1542_vm10, %v1522_v52, %v1177_v23 }
 0x250   : > { %v1872_v29 = vadd.f32 %v2150_v13, %v3900_v27  ;;  %v4418_v13 = vld [vmem:[#allocation43_spill] sm:$0xff] }
 0x251   : > { %1946 = vst.msk [vmem:[%s3907_s11] sm:$0xff] %vm1945_vm13, %v1787_v54  ;;  %v1209_v56 = vpop.permute.xlu1 %1208  ;;  %v1866_v12 = vpop.f32.mrf.mxu1 }
 0x252   : > { %v920_v7 = vpop.permute.xlu0 %919  ;;  %1963 = vst.msk [vmem:[%s3907_s11 + $0x88] sm:$0xff] %vm1945_vm13, %v1872_v29  ;;  %v1867_v33 = vadd.f32 %v3900_v27, %v1866_v12  ;;  %v1571_v24 = vsel %vm1542_vm10, %v1538_v19, %v1209_v56  ;;  %v4419_v29 = vld [vmem:[#allocation26_spill] sm:$0xff]  ;;  %v4420_v12 = vld [vmem:[#allocation40_spill] sm:$0xff] }
 0x253   : > { %v1459_v56 = vsel %vm1443_vm7, %v4419_v29, %v4418_v13 }
 0x254   : > { %1962 = vst.msk [vmem:[%s3907_s11 + $0x80] sm:$0xff] %vm1945_vm13, %v1867_v33  ;;  %v1474_v33 = vsel %vm1443_vm7, %v4420_v12, %v920_v7 }
 0x255   : > { %v1179_v3 = vpop.permute.xlu1 %1178 }
 0x256   : > { %v1211_v15 = vpop.permute.xlu0 %1210  ;;  %v1556_v40 = vsel %vm1542_vm10, %v1523_v9, %v1179_v3 }
 0x257   : > { %v1572_v2 = vsel %vm1542_vm10, %v1539_v35, %v1211_v15 }
 0x259   : > { %v1273_v39 = vpop.permute.xlu1 %1272 }
 0x25a   : > { %v1305_v41 = vpop.permute.xlu0 %1304  ;;  %v1588_v46 = vsel %vm1575_vm11, %v1555_v51, %v1273_v39 }
 0x25b   : > { %v1604_v5 = vsel %vm1575_vm11, %v1571_v24, %v1305_v41  ;;  %2142 = vmatprep.mubr.msk.f32.mxu0 %vm1619_vm12, %v1588_v46 }
 0x25c   : > { %2166 = vmatprep.mubr.msk.f32.mxu1 %vm1619_vm12, %v1604_v5 }
 0x25d   : > { %v922_v45 = vpop.permute.xlu1 %921 }
 0x25e   : > { %v989_v62 = vpop.permute.xlu0 %988  ;;  %v1475_v31 = vsel %vm1443_vm7, %v4421_v25, %v922_v45 }
 0x25f   : > { %v1491_v26 = vsel %vm1476_vm8, %v1458_v8, %v989_v62 }
 0x261   : > { %v1021_v32 = vpop.permute.xlu1 %1020 }
 0x262   : > { %v1275_v57 = vpop.permute.xlu0 %1274  ;;  %v1507_v7 = vsel %vm1476_vm8, %v1474_v33, %v1021_v32 }
 0x263   : > { %v1589_v61 = vsel %vm1575_vm11, %v1556_v40, %v1275_v57 }
 0x264   : > { %2143 = vmatmul.mubr.msk.f32.gmra.mxu0 %vm1619_vm12, %v1589_v61 }
 0x265   : > { %v1307_v36 = vpop.permute.xlu1 %1306 }
 0x266   : > { %v991_v59 = vpop.permute.xlu0 %990  ;;  %v1605_v42 = vsel %vm1575_vm11, %v1572_v2, %v1307_v36 }
 0x267   : > { %2167 = vmatmul.mubr.msk.f32.gmra.mxu1 %vm1619_vm12, %v1605_v42  ;;  %v1492_v18 = vsel %vm1476_vm8, %v1459_v56, %v991_v59 }
 0x269   : > { %v1023_v53 = vpop.permute.xlu1 %1022 }
 0x26a   : > { %v1085_v4 = vpop.permute.xlu0 %1084  ;;  %v1508_v19 = vsel %vm1476_vm8, %v1475_v31, %v1023_v53 }
 0x26b   : > { %v1524_v28 = vsel %vm1509_vm9, %v1491_v26, %v1085_v4 }
 0x26d   : > { %v2209_v10 = vpop.permute.xlu1 %2208 }
 0x26e   : > { %v1087_v1 = vpop.permute.xlu0 %1086  ;;  %v2210_v43 = vunpack.i.l.bf16 %v2209_v10  ;;  %v2211_v3 = vunpack.i.h.bf16 %v2209_v10 }
 0x26f   : > { %v1525_v52 = vsel %vm1509_vm9, %v1492_v18, %v1087_v1 }
 0x270   : > { %v2129_v63 = vpop.f32.mrf.mxu0  ;;  %v1540_v51 = vsel %vm1509_vm9, %v1507_v7, %v2210_v43  ;;  %v1541_v46 = vsel %vm1509_vm9, %v1508_v19, %v2211_v3 }
 0x271   : > { %v1802_v47 = vadd.f32 %v2129_v63, %v3900_v27  ;;  %v1181_v50 = vpop.permute.xlu1 %1180 }
 0x272   : > { %v2214_v58 = vpop.permute.xlu0 %2213  ;;  %v1796_v17 = vpop.f32.mrf.mxu0  ;;  %v1557_v6 = vsel %vm1542_vm10, %v1524_v28, %v1181_v50 }
 0x273   : > { %1949 = vst.msk [vmem:[%s3907_s11 + $0x18] sm:$0xff] %vm1945_vm13, %v1802_v47  ;;  %v1797_v16 = vadd.f32 %v3900_v27, %v1796_v17  ;;  %v2153_v55 = vpop.f32.mrf.mxu1  ;;  %v2216_v11 = vunpack.i.h.bf16 %v2214_v58  ;;  %v2215_v21 = vunpack.i.l.bf16 %v2214_v58 }
 0x274   : > { %v1882_v23 = vadd.f32 %v2153_v55, %v3900_v27 }
 0x275   : > { %1948 = vst.msk [vmem:[%s3907_s11 + $0x10] sm:$0xff] %vm1945_vm13, %v1797_v16  ;;  %v1183_v0 = vpop.permute.xlu1 %1182  ;;  %v1876_v15 = vpop.f32.mrf.mxu1  ;;  %v1573_v38 = vsel %vm1542_vm10, %v1540_v51, %v2215_v21  ;;  %v1574_v37 = vsel %vm1542_vm10, %v1541_v46, %v2216_v11 }
 0x276   : > { %v1277_v54 = vpop.permute.xlu0 %1276  ;;  %1965 = vst.msk [vmem:[%s3907_s11 + $0x98] sm:$0xff] %vm1945_vm13, %v1882_v23  ;;  %v1877_v30 = vadd.f32 %v3900_v27, %v1876_v15  ;;  %v1558_v24 = vsel %vm1542_vm10, %v1525_v52, %v1183_v0 }
 0x277   : > { %v1590_v49 = vsel %vm1575_vm11, %v1557_v6, %v1277_v54 }
 0x278   : > { %2145 = vmatprep.mubr.msk.f32.mxu0 %vm1619_vm12, %v1590_v49  ;;  %1964 = vst.msk [vmem:[%s3907_s11 + $0x90] sm:$0xff] %vm1945_vm13, %v1877_v30 }
 0x279   : > { %v2219_v39 = vpop.permute.xlu1 %2218 }
 0x27a   : > { %v1279_v41 = vpop.permute.xlu0 %1278  ;;  %v2221_v5 = vunpack.i.h.bf16 %v2219_v39  ;;  %v2220_v45 = vunpack.i.l.bf16 %v2219_v39 }
 0x27b   : > { %v1591_v62 = vsel %vm1575_vm11, %v1558_v24, %v1279_v41 }
 0x27c   : > { %2146 = vmatmul.mubr.msk.f32.gmra.mxu0 %vm1619_vm12, %v1591_v62  ;;  %v1606_v48 = vsel %vm1575_vm11, %v1573_v38, %v2220_v45  ;;  %v1607_v22 = vsel %vm1575_vm11, %v1574_v37, %v2221_v5 }
 0x27d   : > { %2169 = vmatprep.mubr.msk.f32.mxu1 %vm1619_vm12, %v1606_v48 }
 0x27e   : > { %2170 = vmatmul.mubr.msk.f32.gmra.mxu1 %vm1619_vm12, %v1607_v22 }
 0x294   : > { %v2132_v9 = vpop.f32.mrf.mxu0 }
 0x295   : > { %v1812_v40 = vadd.f32 %v2132_v9, %v3900_v27 }
 0x296   : > { %v1806_v32 = vpop.f32.mrf.mxu0 }
 0x297   : > { %1951 = vst.msk [vmem:[%s3907_s11 + $0x28] sm:$0xff] %vm1945_vm13, %v1812_v40  ;;  %v1807_v57 = vadd.f32 %v3900_v27, %v1806_v32  ;;  %v2156_v60 = vpop.f32.mrf.mxu1 }
 0x298   : > { %v1892_v34 = vadd.f32 %v2156_v60, %v3900_v27 }
 0x299   : > { %1950 = vst.msk [vmem:[%s3907_s11 + $0x20] sm:$0xff] %vm1945_vm13, %v1807_v57  ;;  %v1886_v61 = vpop.f32.mrf.mxu1 }
 0x29a   : > { %1967 = vst.msk [vmem:[%s3907_s11 + $0xa8] sm:$0xff] %vm1945_vm13, %v1892_v34  ;;  %v1887_v20 = vadd.f32 %v3900_v27, %v1886_v61 }
 0x29c   : > { %1966 = vst.msk [vmem:[%s3907_s11 + $0xa0] sm:$0xff] %vm1945_vm13, %v1887_v20 }
 0x2b8   : > { %v2135_v35 = vpop.f32.mrf.mxu0 }
 0x2b9   : > { %v1822_v2 = vadd.f32 %v2135_v35, %v3900_v27 }
 0x2ba   : > { %v1816_v36 = vpop.f32.mrf.mxu0 }
 0x2bb   : > { %1953 = vst.msk [vmem:[%s3907_s11 + $0x38] sm:$0xff] %vm1945_vm13, %v1822_v2  ;;  %v1817_v59 = vadd.f32 %v3900_v27, %v1816_v36  ;;  %v2159_v42 = vpop.f32.mrf.mxu1 }
 0x2bc   : > { %v1902_v53 = vadd.f32 %v2159_v42, %v3900_v27 }
 0x2bd   : > { %1952 = vst.msk [vmem:[%s3907_s11 + $0x30] sm:$0xff] %vm1945_vm13, %v1817_v59  ;;  %v1896_v4 = vpop.f32.mrf.mxu1 }
 0x2be   : > { %1969 = vst.msk [vmem:[%s3907_s11 + $0xb8] sm:$0xff] %vm1945_vm13, %v1902_v53  ;;  %v1897_v10 = vadd.f32 %v3900_v27, %v1896_v4 }
 0x2c0   : > { %1968 = vst.msk [vmem:[%s3907_s11 + $0xb0] sm:$0xff] %vm1945_vm13, %v1897_v10 }
 0x2dc   : > { %v2138_v1 = vpop.f32.mrf.mxu0 }
 0x2dd   : > { %v1832_v63 = vadd.f32 %v2138_v1, %v3900_v27 }
 0x2de   : > { %v1826_v47 = vpop.f32.mrf.mxu0 }
 0x2df   : > { %1955 = vst.msk [vmem:[%s3907_s11 + $0x48] sm:$0xff] %vm1945_vm13, %v1832_v63  ;;  %v1827_v50 = vadd.f32 %v3900_v27, %v1826_v47  ;;  %v2162_v58 = vpop.f32.mrf.mxu1 }
 0x2e0   : > { %v1912_v44 = vadd.f32 %v2162_v58, %v3900_v27 }
 0x2e1   : > { %1954 = vst.msk [vmem:[%s3907_s11 + $0x40] sm:$0xff] %vm1945_vm13, %v1827_v50  ;;  %v1906_v14 = vpop.f32.mrf.mxu1 }
 0x2e2   : > { %1971 = vst.msk [vmem:[%s3907_s11 + $0xc8] sm:$0xff] %vm1945_vm13, %v1912_v44  ;;  %v1907_v8 = vadd.f32 %v3900_v27, %v1906_v14 }
 0x2e4   : > { %1970 = vst.msk [vmem:[%s3907_s11 + $0xc0] sm:$0xff] %vm1945_vm13, %v1907_v8 }
 0x300   : > { %v2141_v17 = vpop.f32.mrf.mxu0 }
 0x301   : > { %v1842_v26 = vadd.f32 %v2141_v17, %v3900_v27 }
 0x302   : > { %v1836_v16 = vpop.f32.mrf.mxu0 }
 0x303   : > { %1957 = vst.msk [vmem:[%s3907_s11 + $0x58] sm:$0xff] %vm1945_vm13, %v1842_v26  ;;  %v1837_v28 = vadd.f32 %v3900_v27, %v1836_v16  ;;  %v2165_v55 = vpop.f32.mrf.mxu1 }
 0x304   : > { %v1922_v43 = vadd.f32 %v2165_v55, %v3900_v27 }
 0x305   : > { %1956 = vst.msk [vmem:[%s3907_s11 + $0x50] sm:$0xff] %vm1945_vm13, %v1837_v28  ;;  %v1916_v6 = vpop.f32.mrf.mxu1 }
 0x306   : > { %1973 = vst.msk [vmem:[%s3907_s11 + $0xd8] sm:$0xff] %vm1945_vm13, %v1922_v43  ;;  %v1917_v23 = vadd.f32 %v3900_v27, %v1916_v6 }
 0x308   : > { %1972 = vst.msk [vmem:[%s3907_s11 + $0xd0] sm:$0xff] %vm1945_vm13, %v1917_v23 }
 0x324   : > { %v2144_v0 = vpop.f32.mrf.mxu0 }
 0x325   : > { %v1852_v54 = vadd.f32 %v2144_v0, %v3900_v27 }
 0x326   : > { %v1846_v13 = vpop.f32.mrf.mxu0 }
 0x327   : > { %1959 = vst.msk [vmem:[%s3907_s11 + $0x68] sm:$0xff] %vm1945_vm13, %v1852_v54  ;;  %v1847_v29 = vadd.f32 %v3900_v27, %v1846_v13  ;;  %v2168_v56 = vpop.f32.mrf.mxu1 }
 0x328   : > { %v1932_v12 = vadd.f32 %v2168_v56, %v3900_v27 }
 0x329   : > { %1958 = vst.msk [vmem:[%s3907_s11 + $0x60] sm:$0xff] %vm1945_vm13, %v1847_v29  ;;  %v1926_v33 = vpop.f32.mrf.mxu1 }
 0x32a   : > { %1975 = vst.msk [vmem:[%s3907_s11 + $0xe8] sm:$0xff] %vm1945_vm13, %v1932_v12  ;;  %v1927_v3 = vadd.f32 %v3900_v27, %v1926_v33 }
 0x32c   : > { %1974 = vst.msk [vmem:[%s3907_s11 + $0xe0] sm:$0xff] %vm1945_vm13, %v1927_v3 }
 0x33c   : > { %v2147_v15 = vpop.f32.mrf.mxu0 }
 0x33d   : > { %v1862_v49 = vadd.f32 %v2147_v15, %v3900_v27 }
 0x33e   : > { %v1856_v18 = vpop.f32.mrf.mxu0  ;;  %v2171_v21 = vpop.f32.mrf.mxu1 }
 0x33f   : > { %1961 = vst.msk [vmem:[%s3907_s11 + $0x78] sm:$0xff] %vm1945_vm13, %v1862_v49  ;;  %v1857_v11 = vadd.f32 %v3900_v27, %v1856_v18  ;;  %v1942_v30 = vadd.f32 %v2171_v21, %v3900_v27 }
 0x340   : > { %v1936_v25 = vpop.f32.mrf.mxu1 }
 0x341   : > { %1960 = vst.msk [vmem:[%s3907_s11 + $0x70] sm:$0xff] %vm1945_vm13, %v1857_v11  ;;  %1977 = vst.msk [vmem:[%s3907_s11 + $0xf8] sm:$0xff] %vm1945_vm13, %v1942_v30  ;;  %v1937_v31 = vadd.f32 %v3900_v27, %v1936_v25 }
 0x343   : > { %1976 = vst.msk [vmem:[%s3907_s11 + $0xf0] sm:$0xff] %vm1945_vm13, %v1937_v31 }
 0x344 PF: > { %s13_s12 = sadd.s32 1, %s2228_s12  }
 0x345   : > { %p10_p4 = scmp.ge.s32.totalorder %s13_s12, 4  }
 0x347   :  { %12 = sbr.rel (!%p10_p4) target bundleno = 1 (0x1), region = 62 }

</bundles_post_ra>
